<compile_context>
chip_gen: v7x
topology: tpu7x:2x2x1
jax: 0.10.0
libtpu: 0.0.40
codegen_flags: <defaults>
</compile_context>

<pallas_src>
import jax
import jax.numpy as jnp
from jax import lax
from jax.experimental import pallas as pl
from jax.experimental.pallas import tpu as pltpu

EPS = 1e-5


def conv_bn_add_kernel(x_ref, w_ref, gamma_ref, beta_ref, res_ref, o_ref):
    x = x_ref[...]                       # (Cin, M)       f32
    w = w_ref[...]                       # (Co_blk, Cin)  f32

    # 1x1 conv == matmul on the MXU: (Co_blk, Cin) x (Cin, M) -> (Co_blk, M)
    y = lax.dot_general(
        w, x,
        dimension_numbers=(((1,), (0,)), ((), ())),
        preferred_element_type=jnp.float32,
    )

    # BatchNorm (training-mode batch stats, biased 1/M variance) — single pass:
    m = y.shape[1]
    inv_m = 1.0 / m
    s1 = jnp.sum(y, axis=1, keepdims=True)          # (Co_blk, 1)
    s2 = jnp.sum(y * y, axis=1, keepdims=True)      # (Co_blk, 1)
    mean = s1 * inv_m
    var = s2 * inv_m - mean * mean
    scale = gamma_ref[...] * lax.rsqrt(var + EPS)   # gamma folded into rsqrt
    shift = beta_ref[...] - mean * scale

    # normalize + affine + residual, one FMA + one add per element
    o_ref[...] = y * scale + shift + res_ref[...]


def conv_bn_add(x33, x27, weight, gamma, beta, *, block_co=96):
    """x33, x27: (N, C, H, W) f32. weight: (Cout, Cin, 1, 1). gamma/beta: (Cout,)."""
    n, c_in, h, w_sp = x33.shape
    c_out = weight.shape[0]
    m = n * h * w_sp

    # Channels-first flatten: free (pure reshape) for N == 1, which is the
    # layout this module runs with.
    if n == 1:
        x_cf = x33.reshape(c_in, m)
        res_cf = x27.reshape(c_out, m)
    else:
        # TODO(synk): N > 1 needs a real transpose in channels-first layout.
        x_cf = jnp.transpose(x33, (1, 0, 2, 3)).reshape(c_in, m)
        res_cf = jnp.transpose(x27, (1, 0, 2, 3)).reshape(c_out, m)

    w_mat = weight.reshape(c_out, c_in)          # no transpose needed
    gamma2 = gamma.reshape(c_out, 1)
    beta2 = beta.reshape(c_out, 1)

    # Channel-parallel grid: block_co must be sublane-divisible (8) and divide Cout.
    if c_out % block_co != 0 or block_co % 8 != 0:
        block_co = c_out
    n_blocks = c_out // block_co

    cost = pl.CostEstimate(
        flops=2 * m * c_in * c_out,
        transcendentals=c_out,
        bytes_accessed=4 * (m * c_in + c_in * c_out + 2 * m * c_out + 2 * c_out),
    )

    out_cf = pl.pallas_call(
        conv_bn_add_kernel,
        out_shape=jax.ShapeDtypeStruct((c_out, m), jnp.float32),
        grid_spec=pltpu.PrefetchScalarGridSpec(
            num_scalar_prefetch=0,
            grid=(n_blocks,),
            in_specs=[
                pl.BlockSpec((c_in, m), lambda i: (0, 0)),       # x: shared across blocks
                pl.BlockSpec((block_co, c_in), lambda i: (i, 0)),  # weight rows
                pl.BlockSpec((block_co, 1), lambda i: (i, 0)),     # gamma
                pl.BlockSpec((block_co, 1), lambda i: (i, 0)),     # beta
                pl.BlockSpec((block_co, m), lambda i: (i, 0)),     # residual
            ],
            out_specs=pl.BlockSpec((block_co, m), lambda i: (i, 0)),
        ),
        compiler_params=pltpu.CompilerParams(
            dimension_semantics=("parallel",)),
        cost_estimate=cost,
    )(x_cf, w_mat, gamma2, beta2, res_cf)

    if n == 1:
        return out_cf.reshape(1, c_out, h, w_sp)
    return jnp.transpose(out_cf.reshape(c_out, n, h, w_sp), (1, 0, 2, 3))


def _reference(x33, x27, weight, gamma, beta):
    # pure-JAX reference (PyTorch train-mode BN normalization)
    c_out = weight.shape[0]
    w_mat = weight.reshape(c_out, -1)
    y = jnp.einsum('nchw,oc->nohw', x33, w_mat)
    mean = jnp.mean(y, axis=(0, 2, 3), keepdims=True)
    var = jnp.mean((y - mean) ** 2, axis=(0, 2, 3), keepdims=True)
    y_hat = (y - mean) * lax.rsqrt(var + EPS)
    out = y_hat * gamma.reshape(1, c_out, 1, 1) + beta.reshape(1, c_out, 1, 1)
    return x27 + out


if __name__ == "__main__":
    key = jax.random.PRNGKey(0)
    k1, k2, k3, k4, k5 = jax.random.split(key, 5)

    N, C, H, W = 1, 192, 28, 28   # shapes implied by the module
    x33 = jax.random.normal(k1, (N, C, H, W), dtype=jnp.float32)
    x27 = jax.random.normal(k2, (N, C, H, W), dtype=jnp.float32)

    # deterministic synthetic params (Conv2d 192->192 1x1 no bias; BN affine)
    weight = jax.random.normal(k3, (C, C, 1, 1), dtype=jnp.float32) * 0.05
    gamma = 1.0 + 0.1 * jax.random.normal(k4, (C,), dtype=jnp.float32)
    beta = 0.1 * jax.random.normal(k5, (C,), dtype=jnp.float32)

    out = conv_bn_add(x33, x27, weight, gamma, beta)
    out = jax.block_until_ready(out)

    ref = _reference(x33, x27, weight, gamma, beta)
    assert out.shape == (N, C, H, W)
    assert jnp.allclose(out, ref, atol=1e-3, rtol=1e-3), "mismatch vs reference"

    print("KERNEL_OK")
</pallas_src>

<mosaic_0001>
module attributes {stable_mosaic.version = 11 : i64} {
  func.func @conv_bn_add_kernel(%arg0: i32, %arg1: memref<192x784xf32, #tpu.memory_space<vmem>>, %arg2: memref<96x192xf32, #tpu.memory_space<vmem>>, %arg3: memref<96x1xf32, #tpu.memory_space<vmem>>, %arg4: memref<96x1xf32, #tpu.memory_space<vmem>>, %arg5: memref<96x784xf32, #tpu.memory_space<vmem>>, %arg6: memref<96x784xf32, #tpu.memory_space<vmem>>) attributes {dimension_semantics = [#tpu.dimension_semantics<parallel>], iteration_bounds = array<i64: 2>, scalar_prefetch = 0 : i64, scratch_operands = 0 : i64, tpu.core_type = #tpu.core_type<tc>, window_params = [{pipeline_mode = #tpu.pipeline_mode<synchronous>, transform_indices = @transform_0, window_bounds = array<i64: 192, 784>}, {transform_indices = @transform_1, window_bounds = array<i64: 96, 192>}, {transform_indices = @transform_2, window_bounds = array<i64: 96, 1>}, {transform_indices = @transform_3, window_bounds = array<i64: 96, 1>}, {transform_indices = @transform_4, window_bounds = array<i64: 96, 784>}, {transform_indices = @transform_5, window_bounds = array<i64: 96, 784>}]} {
    %c0 = arith.constant 0 : index
    %c0_0 = arith.constant 0 : index
    %0 = vector.load %arg1[%c0, %c0_0] : memref<192x784xf32, #tpu.memory_space<vmem>>, vector<192x784xf32>
    %c0_1 = arith.constant 0 : index
    %c0_2 = arith.constant 0 : index
    %1 = vector.load %arg2[%c0_1, %c0_2] : memref<96x192xf32, #tpu.memory_space<vmem>>, vector<96x192xf32>
    %cst = arith.constant dense<0.000000e+00> : vector<96x784xf32>
    %2 = tpu.matmul %1, %0, %cst {dimension_numbers = #tpu.dot_dimension_numbers<[1], [0], [0], [1], [0, 0, 1, 1], [], []>} : vector<96x192xf32>, vector<192x784xf32>, vector<96x784xf32> -> vector<96x784xf32>
    %cst_3 = arith.constant dense<0.000000e+00> : vector<96xf32>
    %3 = vector.multi_reduction <add>, %2, %cst_3 [1] : vector<96x784xf32> to vector<96xf32>
    %4 = vector.shape_cast %3 : vector<96xf32> to vector<96x1xf32>
    %5 = arith.mulf %2, %2 : vector<96x784xf32>
    %cst_4 = arith.constant dense<0.000000e+00> : vector<96xf32>
    %6 = vector.multi_reduction <add>, %5, %cst_4 [1] : vector<96x784xf32> to vector<96xf32>
    %7 = vector.shape_cast %6 : vector<96xf32> to vector<96x1xf32>
    %cst_5 = arith.constant 0.00127551018 : f32
    %8 = vector.broadcast %cst_5 : f32 to vector<96x1xf32>
    %9 = arith.mulf %4, %8 : vector<96x1xf32>
    %cst_6 = arith.constant 0.00127551018 : f32
    %10 = vector.broadcast %cst_6 : f32 to vector<96x1xf32>
    %11 = arith.mulf %7, %10 : vector<96x1xf32>
    %12 = arith.mulf %9, %9 : vector<96x1xf32>
    %13 = arith.subf %11, %12 : vector<96x1xf32>
    %c0_7 = arith.constant 0 : index
    %c0_8 = arith.constant 0 : index
    %14 = vector.load %arg3[%c0_7, %c0_8] : memref<96x1xf32, #tpu.memory_space<vmem>>, vector<96x1xf32>
    %cst_9 = arith.constant 9.99999974E-6 : f32
    %15 = vector.broadcast %cst_9 : f32 to vector<96x1xf32>
    %16 = arith.addf %13, %15 : vector<96x1xf32>
    %17 = math.rsqrt %16 : vector<96x1xf32>
    %18 = arith.mulf %14, %17 : vector<96x1xf32>
    %c0_10 = arith.constant 0 : index
    %c0_11 = arith.constant 0 : index
    %19 = vector.load %arg4[%c0_10, %c0_11] : memref<96x1xf32, #tpu.memory_space<vmem>>, vector<96x1xf32>
    %20 = arith.mulf %9, %18 : vector<96x1xf32>
    %21 = arith.subf %19, %20 : vector<96x1xf32>
    %22 = vector.broadcast %18 : vector<96x1xf32> to vector<96x784xf32>
    %23 = arith.mulf %2, %22 : vector<96x784xf32>
    %24 = vector.broadcast %21 : vector<96x1xf32> to vector<96x784xf32>
    %25 = arith.addf %23, %24 : vector<96x784xf32>
    %c0_12 = arith.constant 0 : index
    %c0_13 = arith.constant 0 : index
    %26 = vector.load %arg5[%c0_12, %c0_13] : memref<96x784xf32, #tpu.memory_space<vmem>>, vector<96x784xf32>
    %27 = arith.addf %25, %26 : vector<96x784xf32>
    %c0_14 = arith.constant 0 : index
    %c0_15 = arith.constant 0 : index
    %28 = vector.load %arg6[%c0_14, %c0_15] : memref<96x784xf32, #tpu.memory_space<vmem>>, vector<96x784xf32>
    tpu.vector_store %arg6[%c0_14, %c0_15], %27 {strides = array<i32>} : memref<96x784xf32, #tpu.memory_space<vmem>>, vector<96x784xf32>,
    return
  }
  func.func @transform_0(%arg0: i32) -> (i32, i32) {
    %c0_i32 = arith.constant 0 : i32
    %c0_i32_0 = arith.constant 0 : i32
    %c0_i32_1 = arith.constant 0 : i32
    return %c0_i32, %c0_i32_0 : i32, i32
  }
  func.func @transform_1(%arg0: i32) -> (i32, i32) {
    %c0_i32 = arith.constant 0 : i32
    %c0_i32_0 = arith.constant 0 : i32
    return %arg0, %c0_i32 : i32, i32
  }
  func.func @transform_2(%arg0: i32) -> (i32, i32) {
    %c0_i32 = arith.constant 0 : i32
    %c0_i32_0 = arith.constant 0 : i32
    return %arg0, %c0_i32 : i32, i32
  }
  func.func @transform_3(%arg0: i32) -> (i32, i32) {
    %c0_i32 = arith.constant 0 : i32
    %c0_i32_0 = arith.constant 0 : i32
    return %arg0, %c0_i32 : i32, i32
  }
  func.func @transform_4(%arg0: i32) -> (i32, i32) {
    %c0_i32 = arith.constant 0 : i32
    %c0_i32_0 = arith.constant 0 : i32
    return %arg0, %c0_i32 : i32, i32
  }
  func.func @transform_5(%arg0: i32) -> (i32, i32) {
    %c0_i32 = arith.constant 0 : i32
    %c0_i32_0 = arith.constant 0 : i32
    return %arg0, %c0_i32 : i32, i32
  }
}

</mosaic_0001>

<bundles_post_ra>
// kernel: tpu_custom_call.1
= control target key start
LH: loop header
LB: loop body
LE: loop exit
PB: predicated region body
PF: predicated region fallthrough
CT: control target
= control target key end

     0   :  { %10 = vsyncpa [#allocation3], 0  ;;  %s4070_s0 = inlined_call_operand.hbm [shape: f32[192,784], index: 0, kind: input, shape index: {}]   ;;  %s4071_s1 = inlined_call_operand.vmem [shape: f32[192,192], index: 1, kind: input, shape index: {}]   ;;  %s4072_s2 = inlined_call_operand.vmem [shape: f32[192,1], index: 2, kind: input, shape index: {}]   ;;  %s4073_s3 = inlined_call_operand.vmem [shape: f32[192,1], index: 3, kind: input, shape index: {}]   ;;  %s4074_s4 = inlined_call_operand.hbm [shape: f32[192,784], index: 4, kind: input, shape index: {}]   ;;  %s4075_s5 = inlined_call_operand.hbm [shape: f32[192,784], index: 5, kind: output, shape index: {}]  }
   0x1   :  { %11 = vsyncpa [#allocation6], 0 }
   0x2   :  { %13 = vsyncpa [#allocation6 + $0x1], 0 }
   0x3   :  { %14 = vsyncpa [#allocation4], 0 }
   0x4   :  { %16 = vsyncpa [#allocation4 + $0x1], 0  ;;  %s2711_s18 = smov 0   ;;  %s2713_s19 = smov 0  }
   0x5   :  { %s2715_s20 = smov 0   ;;  %s2717_s21 = smov 0  }
   0x6 LB: > { %s2732_s22 = sadd.s32 4294967295, %s2670_s21   ;;  %s2204_s23 = sadd.s32 4294967294, %s2670_s21   ;;  %s2670_s21 = sphi %s2717_s21, %s4245_s21   ;;  %s2666_s20 = sphi %s2715_s20, %s4244_s20   ;;  %s2662_s19 = sphi %s2713_s19, %s4243_s19   ;;  %s2658_s18 = sphi %s2711_s18, %s4242_s18  }
   0x7   : > { %p141_p0 = scmp.ne.s32.totalorder %s2662_s19, %s2658_s18  ;;  %p4076_p1 = scmp.eq.s32.totalorder %s2732_s22, 0 }
   0x8   : > { %p171_p3 = scmp.eq.s32.totalorder %s2204_s23, 1  ;;  %p2205_p5 = scmp.ge.s32.totalorder %s2670_s21, 1 }
   0x9   : > { %p2741_p4 = por %p4076_p1, %p141_p0  ;;  %p178_p7 = scmp.lt.s32.totalorder %s2670_s21, 3 }
   0xa   : > { %p2746_p6 = por %p171_p3, %p141_p0  ;;  %s2672_s27 = smov [#allocation2]  }
   0xb   : > { %s4129_s24 = scalar_select %p2741_p4, 1, 0 }
   0xc   : > { %s4130_s25 = scalar_select %p2746_p6, 1, 0 }
   0xd   : > { %p2751_p8 = pnand %p2205_p5, %p178_p7  ;;  %s190_s28 = sshll.u32 %s2672_s27, 4  ;;  %s191_s28 = int_to_ptr.vmem [resolvable:$true] %s190_s28 }
   0xe   : > { %s2765_s30 = sadd.s32 1, %s2670_s21   ;;  %s2542_s9 = scalar_lea.hbm %s4070_s0, 21504 }
   0xf   : > { %s4131_s26 = scalar_select %p2751_p8, 1, 0 }
  0x10   : > { %p2459_p9 = pneg %p2751_p8  ;;  %s125_s6 = ssub.s32 %s2670_s21, %s2765_s30 }
  0x11   : > { %p2543_p12 = scmp.ne.s32.totalorder %s4070_s0, %s2542_s9  ;;  %p2549_p5 = scmp.lt.u32.totalorder %s2542_s9, %s4070_s0 }
  0x12   : > { %p2760_p11 = pnand %p2459_p9, %p4076_p1 }
  0x14   : > { %p2544_p13 = pneg %p2760_p11 }
  0x16   : > { %p2545_p0 = pnand %p2544_p13, %p2543_p12 }
  0x18   : > { %p2546_p3 = pneg %p2545_p0 }
  0x1a   : > { %p2551_p7 = pnand %p2549_p5, %p2546_p3 }
  0x1c   : > { %2554 = shalt.err (!%p2551_p7)
}
  0x1d   : > { %s2555_s14 = scalar_lea.vmem %s191_s28, 21504  ;;  %p2563_p2 = scmp.lt.s32.totalorder %s191_s28, %s191_s28 }
  0x1e   : > { %p2556_p9 = scmp.ne.s32.totalorder %s191_s28, %s2555_s14  ;;  %p2564_p6 = scmp.lt.s32.totalorder %s2555_s14, %s2555_s14 }
  0x20   : > { %p2558_p10 = pnand %p2556_p9, %p2544_p13  ;;  %p2565_p4 = por %p2564_p6, %p2563_p2 }
  0x22   : > { %p2559_p1 = pneg %p2558_p10 }
  0x24   : > { %p2566_p8 = pnand %p2565_p4, %p2559_p1 }
  0x26   : > { %2569 = shalt.err (!%p2566_p8)
}
  0x27   : > { %s4079_s15 = smov 896   ;;  %s2674_s16 = smov 56  }
  0x28   : > { %2462 = dma.hbm_to_vmem [thread:$0]  (!%p2760_p11), %s4070_s0, 21504, %s191_s28, [#allocation3], %s4079_s15, %s4079_s15, %s2674_s16  }
  0x29   : > { %p126_p1 = scmp.eq.s32.totalorder %s125_s6, 0  ;;  %s128_s27 = sadd.s32 1, %s2666_s20 }
  0x2a   : > { %p135_p2 = scmp.ne.s32.totalorder %s2666_s20, %s2662_s19  ;;  %p136_p4 = scmp.eq.s32.totalorder %s2670_s21, 0 }
  0x2b   : > { %s2793_s7 = scalar_select %p126_p1, %s2666_s20, %s128_s27  }
  0x2c   : > { %p137_p6 = por %p136_p4, %p135_p2  ;;  %p4133_p8 = scmp.eq.s32.totalorder %s2732_s22, 1 }
  0x2d   : > { %p2472_p12 = scmp.lt.s32.totalorder %s2670_s21, 2  ;;  %s232_s29 = sand.u32 1, %s2666_s20  }
  0x2e   : > { %p2797_p10 = por %p4133_p8, %p135_p2  ;;  %s2447_s9 = smul.u32 672, %s232_s29 }
  0x2f   : > { %s2473_s10 = smul.u32 10752, %s2670_s21  ;;  %p2804_p13 = pnand %p2472_p12, %p137_p6 }
  0x30   : > { %s236_s13 = scalar_lea.vmem [#allocation5], %s2447_s9  ;;  %s2815_s17 = scalar_lea.sflag [#allocation6], %s232_s29 }
  0x31   : > { %s2811_s12 = scalar_lea.hbm %s4074_s4, %s2473_s10  ;;  %s244_s14 = sshll.u32 %s236_s13, 4  ;;  %s2813_s14 = int_to_ptr.vmem [resolvable:$true] %s244_s14 }
  0x32   : > { %s2570_s23 = scalar_lea.hbm %s2811_s12, 10752  ;;  %p2572_p0 = pneg %p2804_p13 }
  0x33   : > { %p2571_p11 = scmp.ne.s32.totalorder %s2811_s12, %s2570_s23  ;;  %s2575_s28 = scalar_lea.hbm %s4074_s4, 21504 }
  0x34   : > { %p2576_p7 = scmp.lt.u32.totalorder %s2811_s12, %s4074_s4  ;;  %p2577_p9 = scmp.lt.u32.totalorder %s2575_s28, %s2570_s23 }
  0x35   : > { %p2573_p3 = pnand %p2572_p0, %p2571_p11  ;;  %p2579_p2 = scmp.lt.u32.totalorder %s2570_s23, %s2811_s12 }
  0x36   : > { %p2578_p1 = por %p2577_p9, %p2576_p7 }
  0x37   : > { %p2574_p5 = pneg %p2573_p3 }
  0x38   : > { %p2580_p4 = por %p2579_p2, %p2578_p1 }
  0x3a   : > { %p2581_p6 = pnand %p2580_p4, %p2574_p5 }
  0x3c   : > { %2584 = shalt.err (!%p2581_p6)
}
  0x3d   : > { %s2585_s29 = scalar_lea.vmem %s2813_s14, 10752  ;;  %s2675_s9 = smov [#allocation5]  }
  0x3e   : > { %p2586_p8 = scmp.ne.s32.totalorder %s2813_s14, %s2585_s29  ;;  %s2590_s13 = sshll.u32 %s2675_s9, 4  ;;  %s2591_s13 = int_to_ptr.vmem [resolvable:$false] %s2590_s13 }
  0x3f   : > { %s2592_s15 = scalar_lea.vmem %s2591_s13, 21504  ;;  %p2593_p3 = scmp.lt.s32.totalorder %s2813_s14, %s2591_s13 }
  0x40   : > { %p2588_p12 = pnand %p2586_p8, %p2572_p0  ;;  %p2594_p7 = scmp.lt.s32.totalorder %s2592_s15, %s2585_s29 }
  0x42   : > { %p2589_p11 = pneg %p2588_p12  ;;  %p2595_p9 = por %p2594_p7, %p2593_p3 }
  0x44   : > { %p2596_p1 = pnand %p2595_p9, %p2589_p11 }
  0x46   : > { %2599 = shalt.err (!%p2596_p1)
}
  0x47   : > { %s4136_s23 = smov 896   ;;  %p4137_p0 = scmp.ne.s32.totalorder %s4131_s26, 0 }
  0x48   : > { %2466 = dma.hbm_to_vmem [thread:$0]  (!%p2804_p13), %s2811_s12, 10752, %s2813_s14, %s2815_s17, %s4136_s23, %s4136_s23, %s2674_s16  }
  0x49   : > { %256 = sbr.rel (%p4137_p0) target bundleno = 794 (0x31a), region = 40 }
  0x50   : > { %p4138_p5 = scmp.eq.s32.totalorder %s2732_s22, 0 }
  0x52   : > { %2645 = dma.done.wait (%p4138_p5), [#allocation3], 21504   ;;  %p4139_p2 = pmov %p4138_p5 }
  0x53   : > { %s2853_s27 = sand.u32 1, %s2662_s19   ;;  %p4140_p13 = scmp.ne.s32.totalorder %s4129_s24, 0 }
  0x54   : > { %2647 = vsyncadd (%p4139_p2), [#allocation3], 4294945792  ;;  %s2449_s11 = smul.u32 672, %s2853_s27  ;;  %s263_s10 = scalar_lea.sflag [#allocation6], %s2853_s27 }
  0x56   : > { %s2859_s16 = scalar_lea.vmem [#allocation5], %s2449_s11 }
  0x57   : > { %2649 = dma.done.wait (%p4140_p13), %s263_s10, 10752  }
  0x58   : > { %2651 = vsyncadd (%p4140_p13), %s263_s10, 4294956544  ;;  %v331_v0 = vld [vmem:[#allocation2 + $0x8] sm:$0xff]  ;;  %v338_v1 = vld [vmem:[#allocation2 + $0x40] sm:$0xff]  ;;  %s309_s24 = smul.u32 12, %s2732_s22  ;;  %vm522_vm0 = vcmask 523264   ;;  %vm1100_vm1 = vcmask 130048  }
  0x59   : > { %v330_v2 = vld [vmem:[#allocation2] sm:$0xff]  ;;  %v2267_v3 = vpack.c.bf16 %v338_v1, %v331_v0  ;;  %v337_v4 = vld [vmem:[#allocation2 + $0x38] sm:$0xff]  ;;  %v340_v6 = vld [vmem:[#allocation2 + $0x50] sm:$0xff]  ;;  %s2069_s14 = scalar_lea.sflag [#allocation4], %s2853_s27 }
  0x5a   : > { %v333_v5 = vld [vmem:[#allocation2 + $0x18] sm:$0xff]  ;;  %v2269_v7 = vpack.c.bf16 %v337_v4, %v330_v2  ;;  %v352_v10 = vld [vmem:[#allocation2 + $0xb0] sm:$0xff]  ;;  %v339_v13 = vld [vmem:[#allocation2 + $0x48] sm:$0xff]  ;;  %p2868_p4 = scmp.lt.s32.totalorder %s309_s24, 23 }
  0x5b   : > { %v2315_v8 = vpack.c.bf16 %v340_v6, %v333_v5  ;;  %v345_v9 = vld [vmem:[#allocation2 + $0x78] sm:$0xff]  ;;  %v332_v11 = vld [vmem:[#allocation2 + $0x10] sm:$0xff]  ;;  %2268 = vmatprep.subr.bf16.mxu0 %v2267_v3  ;;  %v351_v15 = vld [vmem:[#allocation2 + $0xa8] sm:$0xff] }
  0x5c   : > { %v2271_v12 = vpack.c.bf16 %v352_v10, %v345_v9  ;;  %v344_v14 = vld [vmem:[#allocation2 + $0x70] sm:$0xff]  ;;  %2270 = vmatpush1.bf16.msra.mxu0 %v2269_v7  ;;  %v2317_v16 = vpack.c.bf16 %v339_v13, %v332_v11  ;;  %v347_v18 = vld [vmem:[#allocation2 + $0x88] sm:$0xff]  ;;  %v354_v19 = vld [vmem:[#allocation2 + $0xc0] sm:$0xff]  ;;  %s4247_s24 = smov (!%p2868_p4, %s309_s24), 23 }
  0x5d   : > { %2316 = vmatprep.subr.bf16.mxu1 %v2315_v8  ;;  %v2273_v17 = vpack.c.bf16 %v351_v15, %v344_v14  ;;  %v359_v20 = vld [vmem:[#allocation2 + $0xe8] sm:$0xff]  ;;  %v2319_v21 = vpack.c.bf16 %v354_v19, %v347_v18  ;;  %v366_v22 = vld [vmem:[#allocation2 + $0x120] sm:$0xff]  ;;  %v353_v24 = vld [vmem:[#allocation2 + $0xb8] sm:$0xff]  ;;  %s2266_s12 = sshll.u32 %s4247_s24, 4  ;;  %s2213_s6 = sshll.u32 %s4247_s24, 3 }
  0x5e   : > { %2272 = vmatprep.subr.bf16.mxu0 %v2271_v12  ;;  %v346_v23 = vld [vmem:[#allocation2 + $0x80] sm:$0xff]  ;;  %2318 = vmatpush1.bf16.msra.mxu1 %v2317_v16  ;;  %v2275_v25 = vpack.c.bf16 %v366_v22, %v359_v20  ;;  %v365_v28 = vld [vmem:[#allocation2 + $0x118] sm:$0xff]  ;;  %v368_v30 = vld [vmem:[#allocation2 + $0x130] sm:$0xff]  ;;  %s2882_s28 = scalar_lea.vmem %s4071_s1, %s2266_s12  ;;  %s3634_s13 = scalar_lea.vmem %s4072_s2, %s2213_s6 }
  0x5f   : > { %v2321_v26 = vpack.c.bf16 %v353_v24, %v346_v23  ;;  %v358_v27 = vld [vmem:[#allocation2 + $0xe0] sm:$0xff]  ;;  %v361_v29 = vld [vmem:[#allocation2 + $0xf8] sm:$0xff]  ;;  %2320 = vmatprep.subr.bf16.mxu1 %v2319_v21  ;;  %v380_v32 = vld [vmem:[#allocation2 + $0x190] sm:$0xff]  ;;  %s3651_s10 = scalar_lea.vmem %s4073_s3, %s2213_s6  ;;  %s3735_s24 = scalar_lea.vmem [#allocation7], %s2449_s11 }
  0x60   : > { %v373_v31 = vld [vmem:[#allocation2 + $0x158] sm:$0xff]  ;;  %2274 = vmatpush1.bf16.msra.mxu0 %v2273_v17  ;;  %v2277_v33 = vpack.c.bf16 %v365_v28, %v358_v27  ;;  %v2323_v34 = vpack.c.bf16 %v368_v30, %v361_v29  ;;  %v360_v35 = vld [vmem:[#allocation2 + $0xf0] sm:$0xff]  ;;  %v367_v36 = vld [vmem:[#allocation2 + $0x128] sm:$0xff]  ;;  %s2475_s11 = smul.u32 10752, %s2732_s22  ;;  %s2083_s22 = sshll.u32 %s3735_s24, 4  ;;  %s4020_s22 = int_to_ptr.vmem [resolvable:$true] %s2083_s22 }
  0x61   : > { %v372_v37 = vld [vmem:[#allocation2 + $0x150] sm:$0xff]  ;;  %2276 = vmatprep.subr.bf16.mxu0 %v2275_v25  ;;  %v2279_v38 = vpack.c.bf16 %v380_v32, %v373_v31  ;;  %v379_v39 = vld [vmem:[#allocation2 + $0x188] sm:$0xff]  ;;  %v382_v41 = vld [vmem:[#allocation2 + $0x1a0] sm:$0xff]  ;;  %v2325_v42 = vpack.c.bf16 %v367_v36, %v360_v35  ;;  %s2600_s17 = scalar_lea.vmem %s4020_s22, 10752 }
  0x62   : > { %v375_v40 = vld [vmem:[#allocation2 + $0x168] sm:$0xff]  ;;  %2322 = vmatpush1.bf16.msra.mxu1 %v2321_v26  ;;  %v394_v44 = vld [vmem:[#allocation2 + $0x200] sm:$0xff]  ;;  %v381_v47 = vld [vmem:[#allocation2 + $0x198] sm:$0xff]  ;;  %v2281_v48 = vpack.c.bf16 %v379_v39, %v372_v37  ;;  %s4016_s12 = scalar_lea.hbm %s4075_s5, %s2475_s11  ;;  %p2601_p6 = scmp.ne.s32.totalorder %s4020_s22, %s2600_s17 }
  0x63   : > { %v387_v43 = vld [vmem:[#allocation2 + $0x1c8] sm:$0xff]  ;;  %2324 = vmatprep.subr.bf16.mxu1 %v2323_v34  ;;  %v2327_v45 = vpack.c.bf16 %v382_v41, %v375_v40  ;;  %v374_v46 = vld [vmem:[#allocation2 + $0x160] sm:$0xff]  ;;  %v389_v49 = vld [vmem:[#allocation2 + $0x1d8] sm:$0xff] }
  0x64   : > { %2278 = vmatpush1.bf16.msra.mxu0 %v2277_v33  ;;  %v396_v50 = vld [vmem:[#allocation2 + $0x210] sm:$0xff]  ;;  %v2283_v51 = vpack.c.bf16 %v394_v44, %v387_v43  ;;  %v386_v52 = vld [vmem:[#allocation2 + $0x1c0] sm:$0xff]  ;;  %v393_v53 = vld [vmem:[#allocation2 + $0x1f8] sm:$0xff]  ;;  %v2329_v54 = vpack.c.bf16 %v381_v47, %v374_v46  ;;  %p2602_p8 = pnand %p2601_p6, %p2797_p10 }
  0x65   : > { %2280 = vmatprep.subr.bf16.mxu0 %v2279_v38  ;;  %v401_v55 = vld [vmem:[#allocation2 + $0x238] sm:$0xff]  ;;  %v408_v56 = vld [vmem:[#allocation2 + $0x270] sm:$0xff]  ;;  %v2331_v57 = vpack.c.bf16 %v396_v50, %v389_v49  ;;  %v395_v59 = vld [vmem:[#allocation2 + $0x208] sm:$0xff]  ;;  %v2285_v60 = vpack.c.bf16 %v393_v53, %v386_v52 }
  0x66   : > { %2326 = vmatpush1.bf16.msra.mxu1 %v2325_v42  ;;  %v388_v58 = vld [vmem:[#allocation2 + $0x1d0] sm:$0xff]  ;;  %v403_v61 = vld [vmem:[#allocation2 + $0x248] sm:$0xff]  ;;  %v410_v62 = vld [vmem:[#allocation2 + $0x280] sm:$0xff]  ;;  %v2287_v63 = vpack.c.bf16 %v408_v56, %v401_v55  ;;  %p2603_p12 = pneg %p2602_p8 }
  0x67   : > { %2328 = vmatprep.subr.bf16.mxu1 %v2327_v45  ;;  %v400_v0 = vld [vmem:[#allocation2 + $0x230] sm:$0xff]  ;;  %v407_v1 = vld [vmem:[#allocation2 + $0x268] sm:$0xff]  ;;  %v2333_v2 = vpack.c.bf16 %v395_v59, %v388_v58  ;;  %v422_v4 = vld [vmem:[#allocation2 + $0x2e0] sm:$0xff]  ;;  %v2335_v5 = vpack.c.bf16 %v410_v62, %v403_v61 }
  0x68   : > { %2282 = vmatpush1.bf16.msra.mxu0 %v2281_v48  ;;  %v415_v3 = vld [vmem:[#allocation2 + $0x2a8] sm:$0xff]  ;;  %v402_v6 = vld [vmem:[#allocation2 + $0x240] sm:$0xff]  ;;  %v409_v7 = vld [vmem:[#allocation2 + $0x278] sm:$0xff]  ;;  %v2289_v8 = vpack.c.bf16 %v407_v1, %v400_v0 }
  0x69   : > { %2284 = vmatprep.subr.bf16.mxu0 %v2283_v51  ;;  %v417_v9 = vld [vmem:[#allocation2 + $0x2b8] sm:$0xff]  ;;  %v424_v10 = vld [vmem:[#allocation2 + $0x2f0] sm:$0xff]  ;;  %v2291_v11 = vpack.c.bf16 %v422_v4, %v415_v3  ;;  %v414_v12 = vld [vmem:[#allocation2 + $0x2a0] sm:$0xff]  ;;  %v2337_v14 = vpack.c.bf16 %v409_v7, %v402_v6 }
  0x6a   : > { %2330 = vmatpush1.bf16.msra.mxu1 %v2329_v54  ;;  %v421_v13 = vld [vmem:[#allocation2 + $0x2d8] sm:$0xff]  ;;  %v436_v16 = vld [vmem:[#allocation2 + $0x350] sm:$0xff]  ;;  %v2339_v17 = vpack.c.bf16 %v424_v10, %v417_v9  ;;  %v423_v19 = vld [vmem:[#allocation2 + $0x2e8] sm:$0xff] }
  0x6b   : > { %2332 = vmatprep.subr.bf16.mxu1 %v2331_v57  ;;  %v429_v15 = vld [vmem:[#allocation2 + $0x318] sm:$0xff]  ;;  %v416_v18 = vld [vmem:[#allocation2 + $0x2b0] sm:$0xff]  ;;  %v2293_v20 = vpack.c.bf16 %v421_v13, %v414_v12  ;;  %v431_v21 = vld [vmem:[#allocation2 + $0x328] sm:$0xff] }
  0x6c   : > { %2286 = vmatpush1.bf16.msra.mxu0 %v2285_v60  ;;  %v438_v22 = vld [vmem:[#allocation2 + $0x360] sm:$0xff]  ;;  %v2295_v23 = vpack.c.bf16 %v436_v16, %v429_v15  ;;  %v428_v24 = vld [vmem:[#allocation2 + $0x310] sm:$0xff]  ;;  %v435_v25 = vld [vmem:[#allocation2 + $0x348] sm:$0xff]  ;;  %v2341_v26 = vpack.c.bf16 %v423_v19, %v416_v18 }
  0x6d   : > { %2288 = vmatprep.subr.bf16.mxu0 %v2287_v63  ;;  %v443_v27 = vld [vmem:[#allocation2 + $0x388] sm:$0xff]  ;;  %v450_v28 = vld [vmem:[#allocation2 + $0x3c0] sm:$0xff]  ;;  %v2343_v29 = vpack.c.bf16 %v438_v22, %v431_v21  ;;  %v437_v31 = vld [vmem:[#allocation2 + $0x358] sm:$0xff]  ;;  %v2297_v32 = vpack.c.bf16 %v435_v25, %v428_v24 }
  0x6e   : > { %2334 = vmatpush1.bf16.msra.mxu1 %v2333_v2  ;;  %v430_v30 = vld [vmem:[#allocation2 + $0x320] sm:$0xff]  ;;  %v445_v33 = vld [vmem:[#allocation2 + $0x398] sm:$0xff]  ;;  %v452_v34 = vld [vmem:[#allocation2 + $0x3d0] sm:$0xff]  ;;  %v2299_v35 = vpack.c.bf16 %v450_v28, %v443_v27 }
  0x6f   : > { %2336 = vmatprep.subr.bf16.mxu1 %v2335_v5  ;;  %v442_v36 = vld [vmem:[#allocation2 + $0x380] sm:$0xff]  ;;  %v449_v37 = vld [vmem:[#allocation2 + $0x3b8] sm:$0xff]  ;;  %v2345_v38 = vpack.c.bf16 %v437_v31, %v430_v30  ;;  %v464_v40 = vld [vmem:[#allocation2 + $0x430] sm:$0xff]  ;;  %v2347_v42 = vpack.c.bf16 %v452_v34, %v445_v33 }
  0x70   : > { %2290 = vmatpush1.bf16.msra.mxu0 %v2289_v8  ;;  %v457_v39 = vld [vmem:[#allocation2 + $0x3f8] sm:$0xff]  ;;  %v2885_v41 = vld [vmem:[%s2882_s28 + $0x8] sm:$0xff]  ;;  %v444_v43 = vld [vmem:[#allocation2 + $0x390] sm:$0xff]  ;;  %v2301_v45 = vpack.c.bf16 %v449_v37, %v442_v36 }
  0x71   : > { %2292 = vmatprep.subr.bf16.mxu0 %v2291_v11  ;;  %v451_v44 = vld [vmem:[#allocation2 + $0x3c8] sm:$0xff]  ;;  %2215 = vmatprep.mubr.msk.f32.mxu0 %vm522_vm0, %v2885_v41  ;;  %v466_v47 = vld [vmem:[#allocation2 + $0x440] sm:$0xff]  ;;  %v2303_v48 = vpack.c.bf16 %v464_v40, %v457_v39  ;;  %v456_v49 = vld [vmem:[#allocation2 + $0x3f0] sm:$0xff] }
  0x72   : > { %2338 = vmatpush1.bf16.msra.mxu1 %v2337_v14  ;;  %v459_v46 = vld [vmem:[#allocation2 + $0x408] sm:$0xff]  ;;  %2227 = vmatprep.mubr.msk.f32.mxu1 %vm522_vm0, %v2885_v41  ;;  %v2349_v51 = vpack.c.bf16 %v451_v44, %v444_v43  ;;  %v478_v53 = vld [vmem:[#allocation2 + $0x4a0] sm:$0xff]  ;;  %v465_v56 = vld [vmem:[#allocation2 + $0x438] sm:$0xff] }
  0x73   : > { %2340 = vmatprep.subr.bf16.mxu1 %v2339_v17  ;;  %v463_v50 = vld [vmem:[#allocation2 + $0x428] sm:$0xff]  ;;  %v2351_v54 = vpack.c.bf16 %v466_v47, %v459_v46  ;;  %v458_v55 = vld [vmem:[#allocation2 + $0x400] sm:$0xff]  ;;  %v473_v58 = vld [vmem:[#allocation2 + $0x478] sm:$0xff] }
  0x74   : > { %2294 = vmatpush1.bf16.msra.mxu0 %v2293_v20  ;;  %v471_v52 = vld [vmem:[#allocation2 + $0x468] sm:$0xff]  ;;  %v2305_v57 = vpack.c.bf16 %v463_v50, %v456_v49  ;;  %v480_v59 = vld [vmem:[#allocation2 + $0x4b0] sm:$0xff]  ;;  %v470_v61 = vld [vmem:[#allocation2 + $0x460] sm:$0xff]  ;;  %v2353_v63 = vpack.c.bf16 %v465_v56, %v458_v55 }
  0x75   : > { %2296 = vmatprep.subr.bf16.mxu0 %v2295_v23  ;;  %v2307_v60 = vpack.c.bf16 %v478_v53, %v471_v52  ;;  %v477_v62 = vld [vmem:[#allocation2 + $0x498] sm:$0xff]  ;;  %v492_v1 = vld [vmem:[#allocation2 + $0x510] sm:$0xff]  ;;  %v2355_v2 = vpack.c.bf16 %v480_v59, %v473_v58  ;;  %v479_v4 = vld [vmem:[#allocation2 + $0x4a8] sm:$0xff] }
  0x76   : > { %2342 = vmatpush1.bf16.msra.mxu1 %v2341_v26  ;;  %v485_v0 = vld [vmem:[#allocation2 + $0x4d8] sm:$0xff]  ;;  %v472_v3 = vld [vmem:[#allocation2 + $0x470] sm:$0xff]  ;;  %v2309_v5 = vpack.c.bf16 %v477_v62, %v470_v61  ;;  %v487_v6 = vld [vmem:[#allocation2 + $0x4e8] sm:$0xff] }
  0x77   : > { %2344 = vmatprep.subr.bf16.mxu1 %v2343_v29  ;;  %v494_v7 = vld [vmem:[#allocation2 + $0x520] sm:$0xff]  ;;  %v2311_v8 = vpack.c.bf16 %v492_v1, %v485_v0  ;;  %v484_v9 = vld [vmem:[#allocation2 + $0x4d0] sm:$0xff]  ;;  %v491_v10 = vld [vmem:[#allocation2 + $0x508] sm:$0xff]  ;;  %v2357_v11 = vpack.c.bf16 %v479_v4, %v472_v3 }
  0x78   : > { %2298 = vmatpush1.bf16.msra.mxu0 %v2297_v32  ;;  %v335_v12 = vld [vmem:[#allocation2 + $0x28] sm:$0xff]  ;;  %v342_v13 = vld [vmem:[#allocation2 + $0x60] sm:$0xff]  ;;  %v2359_v14 = vpack.c.bf16 %v494_v7, %v487_v6  ;;  %v493_v16 = vld [vmem:[#allocation2 + $0x518] sm:$0xff]  ;;  %v2313_v17 = vpack.c.bf16 %v491_v10, %v484_v9 }
  0x79   : > { %2300 = vmatprep.subr.bf16.mxu0 %v2299_v35  ;;  %v486_v15 = vld [vmem:[#allocation2 + $0x4e0] sm:$0xff]  ;;  %v2363_v18 = vpack.c.bf16 %v342_v13, %v335_v12  ;;  %v341_v20 = vld [vmem:[#allocation2 + $0x58] sm:$0xff]  ;;  %v356_v23 = vld [vmem:[#allocation2 + $0xd0] sm:$0xff]  ;;  %v2676_v35 = vmov 0.0|0.0  }
  0x7a   : > { %2346 = vmatpush1.bf16.msra.mxu1 %v2345_v38  ;;  %v334_v19 = vld [vmem:[#allocation2 + $0x20] sm:$0xff]  ;;  %v2361_v21 = vpack.c.bf16 %v493_v16, %v486_v15  ;;  %v349_v22 = vld [vmem:[#allocation2 + $0x98] sm:$0xff]  ;;  %v336_v24 = vld [vmem:[#allocation2 + $0x30] sm:$0xff] }
  0x7b   : > { %2348 = vmatprep.subr.bf16.mxu1 %v2347_v42  ;;  %v343_v25 = vld [vmem:[#allocation2 + $0x68] sm:$0xff]  ;;  %v2892_v26 = vld [vmem:[%s2882_s28] sm:$0xff]  ;;  %v2365_v27 = vpack.c.bf16 %v341_v20, %v334_v19  ;;  %v2895_v28 = vld [vmem:[%s2882_s28 + $0x18] sm:$0xff]  ;;  %v2367_v29 = vpack.c.bf16 %v356_v23, %v349_v22 }
  0x7c   : > { %2302 = vmatpush1.bf16.msra.mxu0 %v2301_v45  ;;  %v348_v30 = vld [vmem:[#allocation2 + $0x90] sm:$0xff]  ;;  %v355_v31 = vld [vmem:[#allocation2 + $0xc8] sm:$0xff]  ;;  %v2412_v32 = vpack.c.bf16 %v343_v25, %v336_v24  ;;  %v370_v34 = vld [vmem:[#allocation2 + $0x140] sm:$0xff] }
  0x7d   : > { %2304 = vmatprep.subr.bf16.mxu0 %v2303_v48  ;;  %v363_v33 = vld [vmem:[#allocation2 + $0x108] sm:$0xff]  ;;  %v350_v36 = vld [vmem:[#allocation2 + $0xa0] sm:$0xff]  ;;  %v357_v37 = vld [vmem:[#allocation2 + $0xd8] sm:$0xff]  ;;  %v2369_v39 = vpack.c.bf16 %v355_v31, %v348_v30 }
  0x7e   : > { %2350 = vmatpush1.bf16.msra.mxu1 %v2349_v51  ;;  %v2902_v38 = vld [vmem:[%s2882_s28 + $0x10] sm:$0xff]  ;;  %v2906_v40 = vld [vmem:[%s2882_s28 + $0x28] sm:$0xff]  ;;  %v2371_v42 = vpack.c.bf16 %v370_v34, %v363_v33  ;;  %v362_v43 = vld [vmem:[#allocation2 + $0x100] sm:$0xff]  ;;  %v2415_v45 = vpack.c.bf16 %v357_v37, %v350_v36 }
  0x7f   : > { %2352 = vmatprep.subr.bf16.mxu1 %v2351_v54  ;;  %v369_v44 = vld [vmem:[#allocation2 + $0x138] sm:$0xff]  ;;  %v384_v47 = vld [vmem:[#allocation2 + $0x1b0] sm:$0xff]  ;;  %v371_v49 = vld [vmem:[#allocation2 + $0x148] sm:$0xff] }
  0x80   : > { %2306 = vmatpush1.bf16.msra.mxu0 %v2305_v57  ;;  %v377_v46 = vld [vmem:[#allocation2 + $0x178] sm:$0xff]  ;;  %v364_v48 = vld [vmem:[#allocation2 + $0x110] sm:$0xff]  ;;  %v2915_v50 = vld [vmem:[%s2882_s28 + $0x20] sm:$0xff]  ;;  %v2373_v51 = vpack.c.bf16 %v369_v44, %v362_v43 }
  0x81   : > { %2308 = vmatprep.subr.bf16.mxu0 %v2307_v60  ;;  %v2919_v52 = vld [vmem:[%s2882_s28 + $0x38] sm:$0xff]  ;;  %v2375_v53 = vpack.c.bf16 %v384_v47, %v377_v46  ;;  %v376_v54 = vld [vmem:[#allocation2 + $0x170] sm:$0xff]  ;;  %v383_v55 = vld [vmem:[#allocation2 + $0x1a8] sm:$0xff]  ;;  %v2418_v56 = vpack.c.bf16 %v371_v49, %v364_v48 }
  0x82   : > { %2354 = vmatpush1.bf16.msra.mxu1 %v2353_v63  ;;  %v391_v57 = vld [vmem:[#allocation2 + $0x1e8] sm:$0xff]  ;;  %v398_v58 = vld [vmem:[#allocation2 + $0x220] sm:$0xff]  ;;  %v385_v60 = vld [vmem:[#allocation2 + $0x1b8] sm:$0xff]  ;;  %v2377_v62 = vpack.c.bf16 %v383_v55, %v376_v54 }
  0x83   : > { %2356 = vmatprep.subr.bf16.mxu1 %v2355_v2  ;;  %v378_v59 = vld [vmem:[#allocation2 + $0x180] sm:$0xff]  ;;  %v2928_v61 = vld [vmem:[%s2882_s28 + $0x30] sm:$0xff]  ;;  %v2932_v63 = vld [vmem:[%s2882_s28 + $0x48] sm:$0xff]  ;;  %v2379_v0 = vpack.c.bf16 %v398_v58, %v391_v57 }
  0x84   : > { %2310 = vmatpush1.bf16.msra.mxu0 %v2309_v5  ;;  %v390_v1 = vld [vmem:[#allocation2 + $0x1e0] sm:$0xff]  ;;  %v397_v2 = vld [vmem:[#allocation2 + $0x218] sm:$0xff]  ;;  %v2421_v3 = vpack.c.bf16 %v385_v60, %v378_v59  ;;  %v412_v5 = vld [vmem:[#allocation2 + $0x290] sm:$0xff] }
  0x85   : > { %2312 = vmatprep.subr.bf16.mxu0 %v2311_v8  ;;  %v405_v4 = vld [vmem:[#allocation2 + $0x258] sm:$0xff]  ;;  %v392_v6 = vld [vmem:[#allocation2 + $0x1f0] sm:$0xff]  ;;  %v399_v7 = vld [vmem:[#allocation2 + $0x228] sm:$0xff]  ;;  %v2381_v9 = vpack.c.bf16 %v397_v2, %v390_v1 }
  0x86   : > { %2358 = vmatpush1.bf16.msra.mxu1 %v2357_v11  ;;  %v2941_v8 = vld [vmem:[%s2882_s28 + $0x40] sm:$0xff]  ;;  %v2945_v10 = vld [vmem:[%s2882_s28 + $0x58] sm:$0xff]  ;;  %v2383_v11 = vpack.c.bf16 %v412_v5, %v405_v4  ;;  %v404_v12 = vld [vmem:[#allocation2 + $0x250] sm:$0xff] }
  0x87   : > { %2360 = vmatprep.subr.bf16.mxu1 %v2359_v14  ;;  %v411_v13 = vld [vmem:[#allocation2 + $0x288] sm:$0xff]  ;;  %v2424_v14 = vpack.c.bf16 %v399_v7, %v392_v6  ;;  %v426_v16 = vld [vmem:[#allocation2 + $0x300] sm:$0xff]  ;;  %v2954_v19 = vld [vmem:[%s2882_s28 + $0x50] sm:$0xff] }
  0x88   : > { %2314 = vmatpush1.bf16.msra.mxu0 %v2313_v17  ;;  %v419_v15 = vld [vmem:[#allocation2 + $0x2c8] sm:$0xff]  ;;  %v406_v17 = vld [vmem:[#allocation2 + $0x260] sm:$0xff]  ;;  %v2385_v20 = vpack.c.bf16 %v411_v13, %v404_v12  ;;  %v425_v24 = vld [vmem:[#allocation2 + $0x2f8] sm:$0xff] }
  0x89   : > { %2364 = vmatprep.subr.bf16.mxu0 %v2363_v18  ;;  %v413_v18 = vld [vmem:[#allocation2 + $0x298] sm:$0xff]  ;;  %v2387_v22 = vpack.c.bf16 %v426_v16, %v419_v15  ;;  %v418_v23 = vld [vmem:[#allocation2 + $0x2c0] sm:$0xff]  ;;  %v420_v30 = vld [vmem:[#allocation2 + $0x2d0] sm:$0xff] }
  0x8a   : > { %2362 = vmatpush1.bf16.msra.mxu1 %v2361_v21  ;;  %v2958_v21 = vld [vmem:[%s2882_s28 + $0x68] sm:$0xff]  ;;  %v2427_v25 = vpack.c.bf16 %v413_v18, %v406_v17  ;;  %v2389_v33 = vpack.c.bf16 %v425_v24, %v418_v23  ;;  %v2971_v34 = vld [vmem:[%s2882_s28 + $0x78] sm:$0xff]  ;;  %v432_v37 = vld [vmem:[#allocation2 + $0x330] sm:$0xff] }
  0x8b   : > { %624 = vmatmul.mubr.f32.vlgmr.msra.gmra.mrb[0].mxu0 %v2892_v26  ;;  %2411 = vmatprep.subr.bf16.mxu1 %v2676_v35  ;;  %v427_v31 = vld [vmem:[#allocation2 + $0x308] sm:$0xff]  ;;  %v454_v44 = vld [vmem:[#allocation2 + $0x3e0] sm:$0xff]  ;;  %v441_v46 = vld [vmem:[#allocation2 + $0x378] sm:$0xff] }
  0x8c   : > { %2366 = vmatpush1.bf16.msra.mxu0 %v2365_v27  ;;  %2216 = vmatprep.mubr.msk.f32.mxu0 %vm522_vm0, %v2895_v28  ;;  %v433_v27 = vld [vmem:[#allocation2 + $0x338] sm:$0xff]  ;;  %v447_v43 = vld [vmem:[#allocation2 + $0x3a8] sm:$0xff]  ;;  %v2980_v47 = vld [vmem:[%s2882_s28 + $0x70] sm:$0xff] }
  0x8d   : > { %761 = vmatmul.mubr.f32.vlgmr.msra.gmra.mrb[0].mxu1 %v2892_v26  ;;  %2368 = vmatprep.subr.bf16.mxu0 %v2367_v29  ;;  %v440_v29 = vld [vmem:[#allocation2 + $0x370] sm:$0xff]  ;;  %v2984_v49 = vld [vmem:[%s2882_s28 + $0x88] sm:$0xff]  ;;  %v453_v54 = vld [vmem:[#allocation2 + $0x3d8] sm:$0xff] }
  0x8e   : > { %2413 = vmatpush1.bf16.msra.mxu1 %v2412_v32  ;;  %2228 = vmatprep.mubr.msk.f32.mxu1 %vm522_vm0, %v2895_v28  ;;  %v2967_v32 = vld [vmem:[%s2882_s28 + $0x60] sm:$0xff]  ;;  %v2391_v36 = vpack.c.bf16 %v440_v29, %v433_v27  ;;  %v468_v57 = vld [vmem:[#allocation2 + $0x450] sm:$0xff]  ;;  %v455_v59 = vld [vmem:[#allocation2 + $0x3e8] sm:$0xff] }
  0x8f   : > { %630 = vmatmul.mubr.f32.gmra.mrb[2].mxu0 %v2902_v38  ;;  %2414 = vmatprep.subr.bf16.mxu1 %v2676_v35  ;;  %v448_v58 = vld [vmem:[#allocation2 + $0x3b0] sm:$0xff]  ;;  %v2993_v60 = vld [vmem:[%s2882_s28 + $0x80] sm:$0xff]  ;;  %v475_v5 = vld [vmem:[#allocation2 + $0x488] sm:$0xff] }
  0x90   : > { %2370 = vmatpush1.bf16.msra.mxu0 %v2369_v39  ;;  %2217 = vmatprep.mubr.msk.f32.mxu0 %vm522_vm0, %v2906_v40  ;;  %v439_v39 = vld [vmem:[#allocation2 + $0x368] sm:$0xff]  ;;  %v460_v2 = vld [vmem:[#allocation2 + $0x410] sm:$0xff]  ;;  %v2436_v4 = vpack.c.bf16 %v455_v59, %v448_v58  ;;  %v482_v6 = vld [vmem:[#allocation2 + $0x4c0] sm:$0xff] }
  0x91   : > { %767 = vmatmul.mubr.f32.gmra.mrb[2].mxu1 %v2902_v38  ;;  %2372 = vmatprep.subr.bf16.mxu0 %v2371_v42  ;;  %v2430_v42 = vpack.c.bf16 %v427_v31, %v420_v30  ;;  %v2393_v48 = vpack.c.bf16 %v439_v39, %v432_v37  ;;  %v462_v7 = vld [vmem:[#allocation2 + $0x420] sm:$0xff]  ;;  %v3010_v13 = vld [vmem:[%s2882_s28 + $0xa8] sm:$0xff]  ;;  %v481_v16 = vld [vmem:[#allocation2 + $0x4b8] sm:$0xff] }
  0x92   : > { %2416 = vmatpush1.bf16.msra.mxu1 %v2415_v45  ;;  %2229 = vmatprep.mubr.msk.f32.mxu1 %vm522_vm0, %v2906_v40  ;;  %v434_v45 = vld [vmem:[#allocation2 + $0x340] sm:$0xff]  ;;  %v489_v18 = vld [vmem:[#allocation2 + $0x4f8] sm:$0xff]  ;;  %v483_v23 = vld [vmem:[#allocation2 + $0x4c8] sm:$0xff] }
  0x93   : > { %636 = vmatmul.mubr.f32.gmra.mrb[4].mxu0 %v2915_v50  ;;  %2417 = vmatprep.subr.bf16.mxu1 %v2676_v35  ;;  %v2433_v55 = vpack.c.bf16 %v441_v46, %v434_v45  ;;  %v474_v15 = vld [vmem:[#allocation2 + $0x480] sm:$0xff]  ;;  %v3023_v27 = vld [vmem:[%s2882_s28 + $0xb8] sm:$0xff]  ;;  %v488_v30 = vld [vmem:[#allocation2 + $0x4f0] sm:$0xff] }
  0x94   : > { %2374 = vmatpush1.bf16.msra.mxu0 %v2373_v51  ;;  %2218 = vmatprep.mubr.msk.f32.mxu0 %vm522_vm0, %v2919_v52  ;;  %v2395_v51 = vpack.c.bf16 %v454_v44, %v447_v43  ;;  %v3019_v24 = vld [vmem:[%s2882_s28 + $0xa0] sm:$0xff]  ;;  %v495_v31 = vld [vmem:[#allocation2 + $0x528] sm:$0xff]  ;;  %v497_v37 = vld [vmem:[#allocation2 + $0x538] sm:$0xff] }
  0x95   : > { %773 = vmatmul.mubr.f32.gmra.mrb[4].mxu1 %v2915_v50  ;;  %2376 = vmatprep.subr.bf16.mxu0 %v2375_v53  ;;  %v446_v53 = vld [vmem:[#allocation2 + $0x3a0] sm:$0xff]  ;;  %v520_v39 = vld [vmem:[%s2882_s28 + $0xb0] sm:$0xff] }
  0x96   : > { %2419 = vmatpush1.bf16.msra.mxu1 %v2418_v56  ;;  %2230 = vmatprep.mubr.msk.f32.mxu1 %vm522_vm0, %v2919_v52  ;;  %v461_v56 = vld [vmem:[#allocation2 + $0x418] sm:$0xff] }
  0x97   : > { %642 = vmatmul.mubr.f32.gmra.mrb[6].mxu0 %v2928_v61  ;;  %2420 = vmatprep.subr.bf16.mxu1 %v2676_v35  ;;  %v2399_v1 = vpack.c.bf16 %v468_v57, %v461_v56 }
  0x98   : > { %2378 = vmatpush1.bf16.msra.mxu0 %v2377_v62  ;;  %2219 = vmatprep.mubr.msk.f32.mxu0 %vm522_vm0, %v2932_v63  ;;  %v2397_v62 = vpack.c.bf16 %v453_v54, %v446_v53 }
  0x99   : > { %779 = vmatmul.mubr.f32.gmra.mrb[6].mxu1 %v2928_v61  ;;  %2380 = vmatprep.subr.bf16.mxu0 %v2379_v0  ;;  %v2997_v0 = vld [vmem:[%s2882_s28 + $0x98] sm:$0xff] }
  0x9a   : > { %2422 = vmatpush1.bf16.msra.mxu1 %v2421_v3  ;;  %2231 = vmatprep.mubr.msk.f32.mxu1 %vm522_vm0, %v2932_v63  ;;  %v467_v3 = vld [vmem:[#allocation2 + $0x448] sm:$0xff] }
  0x9b   : > { %648 = vmatmul.mubr.f32.gmra.mrb[8].mxu0 %v2941_v8  ;;  %2423 = vmatprep.subr.bf16.mxu1 %v2676_v35  ;;  %v2401_v12 = vpack.c.bf16 %v467_v3, %v460_v2 }
  0x9c   : > { %2382 = vmatpush1.bf16.msra.mxu0 %v2381_v9  ;;  %2220 = vmatprep.mubr.msk.f32.mxu0 %vm522_vm0, %v2945_v10  ;;  %v469_v9 = vld [vmem:[#allocation2 + $0x458] sm:$0xff] }
  0x9d   : > { %785 = vmatmul.mubr.f32.gmra.mrb[8].mxu1 %v2941_v8  ;;  %2384 = vmatprep.subr.bf16.mxu0 %v2383_v11  ;;  %v3006_v11 = vld [vmem:[%s2882_s28 + $0x90] sm:$0xff]  ;;  %v2439_v17 = vpack.c.bf16 %v469_v9, %v462_v7  ;;  %s2678_s28 = smov [#allocation7]  }
  0x9e   : > { %2425 = vmatpush1.bf16.msra.mxu1 %v2424_v14  ;;  %2232 = vmatprep.mubr.msk.f32.mxu1 %vm522_vm0, %v2945_v10  ;;  %v2403_v14 = vpack.c.bf16 %v482_v6, %v475_v5  ;;  %s2604_s6 = sshll.u32 %s2678_s28, 4  ;;  %s2605_s6 = int_to_ptr.vmem [resolvable:$false] %s2604_s6 }
  0x9f   : > { %654 = vmatmul.mubr.f32.gmra.mrb[10].mxu0 %v2954_v19  ;;  %2426 = vmatprep.subr.bf16.mxu1 %v2676_v35  ;;  %s2606_s29 = scalar_lea.vmem %s2605_s6, 21504  ;;  %p2607_p11 = scmp.lt.s32.totalorder %s4020_s22, %s2605_s6 }
  0xa0   : > { %2386 = vmatpush1.bf16.msra.mxu0 %v2385_v20  ;;  %2221 = vmatprep.mubr.msk.f32.mxu0 %vm522_vm0, %v2958_v21  ;;  %v496_v20 = vld [vmem:[#allocation2 + $0x530] sm:$0xff]  ;;  %p2608_p3 = scmp.lt.s32.totalorder %s2606_s29, %s2600_s17 }
  0xa1   : > { %791 = vmatmul.mubr.f32.gmra.mrb[10].mxu1 %v2954_v19  ;;  %2388 = vmatprep.subr.bf16.mxu0 %v2387_v22  ;;  %v476_v22 = vld [vmem:[#allocation2 + $0x490] sm:$0xff]  ;;  %v2407_v29 = vpack.c.bf16 %v496_v20, %v489_v18 }
  0xa2   : > { %2428 = vmatpush1.bf16.msra.mxu1 %v2427_v25  ;;  %2233 = vmatprep.mubr.msk.f32.mxu1 %vm522_vm0, %v2958_v21  ;;  %v2405_v25 = vpack.c.bf16 %v481_v16, %v474_v15  ;;  %p2609_p7 = por %p2608_p3, %p2607_p11 }
  0xa3   : > { %660 = vmatmul.mubr.f32.gmra.mrb[12].mxu0 %v2967_v32  ;;  %2429 = vmatprep.subr.bf16.mxu1 %v2676_v35 }
  0xa4   : > { %2390 = vmatpush1.bf16.msra.mxu0 %v2389_v33  ;;  %2222 = vmatprep.mubr.msk.f32.mxu0 %vm522_vm0, %v2971_v34  ;;  %v2442_v33 = vpack.c.bf16 %v483_v23, %v476_v22  ;;  %p2610_p9 = pnand %p2609_p7, %p2603_p12 }
  0xa5   : > { %797 = vmatmul.mubr.f32.gmra.mrb[12].mxu1 %v2967_v32  ;;  %2392 = vmatprep.subr.bf16.mxu0 %v2391_v36  ;;  %v490_v36 = vld [vmem:[#allocation2 + $0x500] sm:$0xff] }
  0xa6   : > { %2431 = vmatpush1.bf16.msra.mxu1 %v2430_v42  ;;  %2234 = vmatprep.mubr.msk.f32.mxu1 %vm522_vm0, %v2971_v34  ;;  %v2409_v42 = vpack.c.bf16 %v495_v31, %v488_v30  ;;  %v2445_v43 = vpack.c.bf16 %v497_v37, %v490_v36 }
  0xa7   : > { %666 = vmatmul.mubr.f32.gmra.mrb[14].mxu0 %v2980_v47  ;;  %2432 = vmatprep.subr.bf16.mxu1 %v2676_v35 }
  0xa8   : > { %2394 = vmatpush1.bf16.msra.mxu0 %v2393_v48  ;;  %2223 = vmatprep.mubr.msk.f32.mxu0 %vm522_vm0, %v2984_v49 }
  0xa9   : > { %803 = vmatmul.mubr.f32.gmra.mrb[14].mxu1 %v2980_v47  ;;  %2396 = vmatprep.subr.bf16.mxu0 %v2395_v51 }
  0xaa   : > { %2434 = vmatpush1.bf16.msra.mxu1 %v2433_v55  ;;  %2235 = vmatprep.mubr.msk.f32.mxu1 %vm522_vm0, %v2984_v49 }
  0xab   : > { %672 = vmatmul.mubr.f32.gmra.mrb[16].mxu0 %v2993_v60  ;;  %2435 = vmatprep.subr.bf16.mxu1 %v2676_v35 }
  0xac   : > { %2398 = vmatpush1.bf16.msra.mxu0 %v2397_v62  ;;  %2224 = vmatprep.mubr.msk.f32.mxu0 %vm522_vm0, %v2997_v0 }
  0xad   : > { %809 = vmatmul.mubr.f32.gmra.mrb[16].mxu1 %v2993_v60  ;;  %2400 = vmatprep.subr.bf16.mxu0 %v2399_v1 }
  0xae   : > { %2437 = vmatpush1.bf16.msra.mxu1 %v2436_v4  ;;  %2236 = vmatprep.mubr.msk.f32.mxu1 %vm522_vm0, %v2997_v0 }
  0xaf   : > { %678 = vmatmul.mubr.f32.gmra.mrb[18].mxu0 %v3006_v11  ;;  %2438 = vmatprep.subr.bf16.mxu1 %v2676_v35 }
  0xb0   : > { %2402 = vmatpush1.bf16.msra.mxu0 %v2401_v12  ;;  %2225 = vmatprep.mubr.msk.f32.mxu0 %vm522_vm0, %v3010_v13 }
  0xb1   : > { %815 = vmatmul.mubr.f32.gmra.mrb[18].mxu1 %v3006_v11  ;;  %2404 = vmatprep.subr.bf16.mxu0 %v2403_v14 }
  0xb2   : > { %2440 = vmatpush1.bf16.msra.mxu1 %v2439_v17  ;;  %2237 = vmatprep.mubr.msk.f32.mxu1 %vm522_vm0, %v3010_v13 }
  0xb3   : > { %684 = vmatmul.mubr.f32.gmra.mrb[20].mxu0 %v3019_v24  ;;  %2441 = vmatprep.subr.bf16.mxu1 %v2676_v35 }
  0xb4   : > { %2406 = vmatpush1.bf16.msra.mxu0 %v2405_v25  ;;  %2226 = vmatprep.mubr.msk.f32.mxu0 %vm522_vm0, %v3023_v27 }
  0xb5   : > { %821 = vmatmul.mubr.f32.gmra.mrb[20].mxu1 %v3019_v24  ;;  %2408 = vmatprep.subr.bf16.mxu0 %v2407_v29 }
  0xb6   : > { %2443 = vmatpush1.bf16.msra.mxu1 %v2442_v33  ;;  %2238 = vmatprep.mubr.msk.f32.mxu1 %vm522_vm0, %v3023_v27 }
  0xb7   : > { %690 = vmatmul.mubr.f32.gmra.mrb[22].mxu0 %v520_v39  ;;  %2444 = vmatprep.subr.bf16.mxu1 %v2676_v35 }
  0xb8   : > { %2410 = vmatpush1.bf16.msra.mxu0 %v2409_v42  ;;  %2239 = vmatprep.mubr.msk.f32.mxu0 %vm522_vm0, %v2885_v41 }
  0xb9   : > { %827 = vmatmul.mubr.f32.gmra.mrb[22].mxu1 %v520_v39 }
  0xba   : > { %2446 = vmatpush1.bf16.msra.mxu1 %v2445_v43  ;;  %2251 = vmatprep.mubr.msk.f32.mxu1 %vm522_vm0, %v2885_v41 }
  0xbb   : > { %898 = vmatmul.mubr.f32.vlgmr.msra.gmra.mrb[24].mxu0 %v2892_v26 }
  0xbc   : > { %2240 = vmatprep.mubr.msk.f32.mxu0 %vm522_vm0, %v2895_v28 }
  0xbd   : > { %1035 = vmatmul.mubr.f32.vlgmr.msra.gmra.mrb[24].mxu1 %v2892_v26 }
  0xbe   : > { %2252 = vmatprep.mubr.msk.f32.mxu1 %vm522_vm0, %v2895_v28 }
  0xbf   : > { %904 = vmatmul.mubr.f32.gmra.mrb[26].mxu0 %v2902_v38 }
  0xc0   : > { %2241 = vmatprep.mubr.msk.f32.mxu0 %vm522_vm0, %v2906_v40 }
  0xc1   : > { %1040 = vmatmul.mubr.f32.gmra.mrb[26].mxu1 %v2902_v38 }
  0xc2   : > { %2253 = vmatprep.mubr.msk.f32.mxu1 %vm522_vm0, %v2906_v40 }
  0xc3   : > { %910 = vmatmul.mubr.f32.gmra.mrb[28].mxu0 %v2915_v50 }
  0xc4   : > { %2242 = vmatprep.mubr.msk.f32.mxu0 %vm522_vm0, %v2919_v52 }
  0xc5   : > { %1045 = vmatmul.mubr.f32.gmra.mrb[28].mxu1 %v2915_v50 }
  0xc6   : > { %2254 = vmatprep.mubr.msk.f32.mxu1 %vm522_vm0, %v2919_v52 }
  0xc7   : > { %916 = vmatmul.mubr.f32.gmra.mrb[30].mxu0 %v2928_v61 }
  0xc8   : > { %2243 = vmatprep.mubr.msk.f32.mxu0 %vm522_vm0, %v2932_v63 }
  0xc9   : > { %1050 = vmatmul.mubr.f32.gmra.mrb[30].mxu1 %v2928_v61 }
  0xca   : > { %2255 = vmatprep.mubr.msk.f32.mxu1 %vm522_vm0, %v2932_v63 }
  0xcb   : > { %922 = vmatmul.mubr.f32.gmra.mrb[32].mxu0 %v2941_v8 }
  0xcc   : > { %2244 = vmatprep.mubr.msk.f32.mxu0 %vm522_vm0, %v2945_v10 }
  0xcd   : > { %1055 = vmatmul.mubr.f32.gmra.mrb[32].mxu1 %v2941_v8 }
  0xce   : > { %2256 = vmatprep.mubr.msk.f32.mxu1 %vm522_vm0, %v2945_v10 }
  0xcf   : > { %928 = vmatmul.mubr.f32.gmra.mrb[34].mxu0 %v2954_v19 }
  0xd0   : > { %2245 = vmatprep.mubr.msk.f32.mxu0 %vm522_vm0, %v2958_v21 }
  0xd1   : > { %1060 = vmatmul.mubr.f32.gmra.mrb[34].mxu1 %v2954_v19 }
  0xd2   : > { %2257 = vmatprep.mubr.msk.f32.mxu1 %vm522_vm0, %v2958_v21 }
  0xd3   : > { %934 = vmatmul.mubr.f32.gmra.mrb[36].mxu0 %v2967_v32 }
  0xd4   : > { %2246 = vmatprep.mubr.msk.f32.mxu0 %vm522_vm0, %v2971_v34 }
  0xd5   : > { %1065 = vmatmul.mubr.f32.gmra.mrb[36].mxu1 %v2967_v32 }
  0xd6   : > { %2258 = vmatprep.mubr.msk.f32.mxu1 %vm522_vm0, %v2971_v34 }
  0xd7   : > { %940 = vmatmul.mubr.f32.gmra.mrb[38].mxu0 %v2980_v47 }
  0xd8   : > { %2247 = vmatprep.mubr.msk.f32.mxu0 %vm522_vm0, %v2984_v49 }
  0xd9   : > { %1070 = vmatmul.mubr.f32.gmra.mrb[38].mxu1 %v2980_v47 }
  0xda   : > { %2259 = vmatprep.mubr.msk.f32.mxu1 %vm522_vm0, %v2984_v49 }
  0xdb   : > { %946 = vmatmul.mubr.f32.gmra.mrb[40].mxu0 %v2993_v60 }
  0xdc   : > { %2248 = vmatprep.mubr.msk.f32.mxu0 %vm522_vm0, %v2997_v0 }
  0xdd   : > { %1075 = vmatmul.mubr.f32.gmra.mrb[40].mxu1 %v2993_v60 }
  0xde   : > { %2260 = vmatprep.mubr.msk.f32.mxu1 %vm522_vm0, %v2997_v0 }
  0xdf   : > { %952 = vmatmul.mubr.f32.gmra.mrb[42].mxu0 %v3006_v11 }
  0xe0   : > { %2249 = vmatprep.mubr.msk.f32.mxu0 %vm522_vm0, %v3010_v13 }
  0xe1   : > { %1080 = vmatmul.mubr.f32.gmra.mrb[42].mxu1 %v3006_v11 }
  0xe2   : > { %2261 = vmatprep.mubr.msk.f32.mxu1 %vm522_vm0, %v3010_v13 }
  0xe3   : > { %958 = vmatmul.mubr.f32.gmra.mrb[44].mxu0 %v3019_v24 }
  0xe4   : > { %2250 = vmatprep.mubr.msk.f32.mxu0 %vm522_vm0, %v3023_v27 }
  0xe5   : > { %1085 = vmatmul.mubr.f32.gmra.mrb[44].mxu1 %v3019_v24 }
  0xe6   : > { %2262 = vmatprep.mubr.msk.f32.mxu1 %vm522_vm0, %v3023_v27 }
  0xe7   : > { %964 = vmatmul.mubr.f32.gmra.mrb[46].mxu0 %v520_v39 }
  0xe9   : > { %1090 = vmatmul.mubr.f32.gmra.mrb[46].mxu1 %v520_v39 }
 0x15e   : > { %v3106_v41 = vpop.f32.mrb[0].mxu0 }
 0x15f   : > { %v1204_v26 = vmul.f32 %v3106_v41, %v3106_v41  ;;  %v3110_v28 = vpop.f32.mrb[1].mxu0 }
 0x160   : > { %v1095_v35 = vadd.f32 %v3110_v28, %v3106_v41  ;;  %v1205_v38 = vmul.f32 %v3110_v28, %v3110_v28  ;;  %v3116_v40 = vpop.f32.mrb[0].mxu1 }
 0x161   : > { %v1206_v50 = vmul.f32 %v3116_v40, %v3116_v40  ;;  %v3120_v52 = vpop.f32.mrb[1].mxu1 }
 0x162   : > { %v1288_v61 = vadd.f32 %v1205_v38, %v1204_v26  ;;  %v1096_v63 = vadd.f32 %v1095_v35, %v3116_v40  ;;  %v3123_v8 = vpop.f32.mrb[2].mxu0  ;;  %v1207_v19 = vmul.f32 %v3120_v52, %v3120_v52 }
 0x163   : > { %v1211_v10 = vmul.f32 %v3123_v8, %v3123_v8  ;;  %v3129_v21 = vpop.f32.mrb[3].mxu0 }
 0x164   : > { %v1289_v32 = vadd.f32 %v1288_v61, %v1206_v50  ;;  %v3132_v34 = vadd.f32 %v1096_v63, %v3120_v52  ;;  %v1105_v44 = vadd.f32 %v3129_v21, %v3123_v8  ;;  %v1212_v45 = vmul.f32 %v3129_v21, %v3129_v21  ;;  %v3138_v46 = vpop.f32.mrb[2].mxu1 }
 0x165   : > { %v1213_v47 = vmul.f32 %v3138_v46, %v3138_v46  ;;  %v3142_v48 = vpop.f32.mrb[3].mxu1 }
 0x166   : > { %v3144_v49 = vadd.f32 %v1289_v32, %v1207_v19  ;;  %v1297_v51 = vadd.f32 %v1212_v45, %v1211_v10  ;;  %v1106_v53 = vadd.f32 %v1105_v44, %v3138_v46  ;;  %v3147_v54 = vpop.f32.mrb[4].mxu0  ;;  %v1214_v56 = vmul.f32 %v3142_v48, %v3142_v48 }
 0x167   : > { %v1218_v55 = vmul.f32 %v3147_v54, %v3147_v54  ;;  %v3153_v57 = vpop.f32.mrb[5].mxu0 }
 0x168   : > { %v1298_v58 = vadd.f32 %v1297_v51, %v1213_v47  ;;  %v3156_v59 = vadd.f32 %v1106_v53, %v3142_v48  ;;  %v1114_v60 = vadd.f32 %v3153_v57, %v3147_v54  ;;  %v1219_v62 = vmul.f32 %v3153_v57, %v3153_v57  ;;  %v3162_v0 = vpop.f32.mrb[4].mxu1 }
 0x169   : > { %v1220_v1 = vmul.f32 %v3162_v0, %v3162_v0  ;;  %v3166_v2 = vpop.f32.mrb[5].mxu1 }
 0x16a   : > { %v3168_v3 = vadd.f32 %v1298_v58, %v1214_v56  ;;  %v1306_v4 = vadd.f32 %v1219_v62, %v1218_v55  ;;  %v1115_v5 = vadd.f32 %v1114_v60, %v3162_v0  ;;  %v3171_v6 = vpop.f32.mrb[6].mxu0  ;;  %v1221_v9 = vmul.f32 %v3166_v2, %v3166_v2 }
 0x16b   : > { %v1225_v7 = vmul.f32 %v3171_v6, %v3171_v6  ;;  %v3177_v11 = vpop.f32.mrb[7].mxu0 }
 0x16c   : > { %v1307_v12 = vadd.f32 %v1306_v4, %v1220_v1  ;;  %v3180_v13 = vadd.f32 %v1115_v5, %v3166_v2  ;;  %v1123_v14 = vadd.f32 %v3177_v11, %v3171_v6  ;;  %v1226_v15 = vmul.f32 %v3177_v11, %v3177_v11  ;;  %v3186_v16 = vpop.f32.mrb[6].mxu1 }
 0x16d   : > { %v1227_v17 = vmul.f32 %v3186_v16, %v3186_v16  ;;  %v3190_v18 = vpop.f32.mrb[7].mxu1 }
 0x16e   : > { %v3192_v20 = vadd.f32 %v1307_v12, %v1221_v9  ;;  %v1315_v22 = vadd.f32 %v1226_v15, %v1225_v7  ;;  %v1124_v23 = vadd.f32 %v1123_v14, %v3186_v16  ;;  %v3195_v24 = vpop.f32.mrb[8].mxu0  ;;  %v1228_v27 = vmul.f32 %v3190_v18, %v3190_v18 }
 0x16f   : > { %v1232_v25 = vmul.f32 %v3195_v24, %v3195_v24  ;;  %v3201_v29 = vpop.f32.mrb[9].mxu0 }
 0x170   : > { %4142 = vst [vmem:[#allocation11_spill] sm:$0xff] %v3201_v29  ;;  %v1316_v30 = vadd.f32 %v1315_v22, %v1227_v17  ;;  %v3204_v31 = vadd.f32 %v1124_v23, %v3190_v18  ;;  %v1132_v33 = vadd.f32 %v3201_v29, %v3195_v24  ;;  %v1233_v36 = vmul.f32 %v3201_v29, %v3201_v29  ;;  %v3210_v37 = vpop.f32.mrb[8].mxu1 }
 0x171   : > { %4143 = vst [vmem:[#allocation12_spill] sm:$0xff] %v3210_v37  ;;  %v1234_v39 = vmul.f32 %v3210_v37, %v3210_v37  ;;  %v3214_v42 = vpop.f32.mrb[9].mxu1 }
 0x172   : > { %4144 = vst [vmem:[#allocation13_spill] sm:$0xff] %v3214_v42  ;;  %v3216_v43 = vadd.f32 %v1316_v30, %v1228_v27  ;;  %v1324_v26 = vadd.f32 %v1233_v36, %v1232_v25  ;;  %v1133_v35 = vadd.f32 %v1132_v33, %v3210_v37  ;;  %v3219_v38 = vpop.f32.mrb[10].mxu0  ;;  %v1235_v61 = vmul.f32 %v3214_v42, %v3214_v42 }
 0x173   : > { %4145 = vst [vmem:[#allocation14_spill] sm:$0xff] %v3219_v38  ;;  %v1239_v50 = vmul.f32 %v3219_v38, %v3219_v38  ;;  %v3225_v63 = vpop.f32.mrb[11].mxu0 }
 0x174   : > { %4146 = vst [vmem:[#allocation15_spill] sm:$0xff] %v3225_v63  ;;  %v1325_v10 = vadd.f32 %v1324_v26, %v1234_v39  ;;  %v3228_v19 = vadd.f32 %v1133_v35, %v3214_v42  ;;  %v1141_v32 = vadd.f32 %v3225_v63, %v3219_v38  ;;  %v1240_v44 = vmul.f32 %v3225_v63, %v3225_v63  ;;  %v3234_v45 = vpop.f32.mrb[10].mxu1 }
 0x175   : > { %4147 = vst [vmem:[#allocation16_spill] sm:$0xff] %v3234_v45  ;;  %v1241_v47 = vmul.f32 %v3234_v45, %v3234_v45  ;;  %v3238_v51 = vpop.f32.mrb[11].mxu1 }
 0x176   : > { %4148 = vst [vmem:[#allocation17_spill] sm:$0xff] %v3238_v51  ;;  %v3240_v53 = vadd.f32 %v1325_v10, %v1235_v61  ;;  %v1333_v55 = vadd.f32 %v1240_v44, %v1239_v50  ;;  %v1142_v56 = vadd.f32 %v1141_v32, %v3234_v45  ;;  %v3243_v58 = vpop.f32.mrb[12].mxu0  ;;  %v1242_v62 = vmul.f32 %v3238_v51, %v3238_v51 }
 0x177   : > { %4149 = vst [vmem:[#allocation18_spill] sm:$0xff] %v3243_v58  ;;  %v1246_v60 = vmul.f32 %v3243_v58, %v3243_v58  ;;  %v3249_v1 = vpop.f32.mrb[13].mxu0 }
 0x178   : > { %4150 = vst [vmem:[#allocation19_spill] sm:$0xff] %v3249_v1  ;;  %v1334_v4 = vadd.f32 %v1333_v55, %v1241_v47  ;;  %v3252_v5 = vadd.f32 %v1142_v56, %v3238_v51  ;;  %v1150_v7 = vadd.f32 %v3249_v1, %v3243_v58  ;;  %v1247_v9 = vmul.f32 %v3249_v1, %v3249_v1  ;;  %v3258_v12 = vpop.f32.mrb[12].mxu1 }
 0x179   : > { %4151 = vst [vmem:[#allocation20_spill] sm:$0xff] %v3258_v12  ;;  %v1248_v14 = vmul.f32 %v3258_v12, %v3258_v12  ;;  %v3262_v15 = vpop.f32.mrb[13].mxu1 }
 0x17a   : > { %4152 = vst [vmem:[#allocation21_spill] sm:$0xff] %v3262_v15  ;;  %v3264_v17 = vadd.f32 %v1334_v4, %v1242_v62  ;;  %v1342_v22 = vadd.f32 %v1247_v9, %v1246_v60  ;;  %v1151_v23 = vadd.f32 %v1150_v7, %v3258_v12  ;;  %v3267_v25 = vpop.f32.mrb[14].mxu0  ;;  %v1249_v30 = vmul.f32 %v3262_v15, %v3262_v15 }
 0x17b   : > { %4153 = vst [vmem:[#allocation22_spill] sm:$0xff] %v3267_v25  ;;  %v1253_v27 = vmul.f32 %v3267_v25, %v3267_v25  ;;  %v3273_v33 = vpop.f32.mrb[15].mxu0 }
 0x17c   : > { %4154 = vst [vmem:[#allocation23_spill] sm:$0xff] %v3273_v33  ;;  %v1343_v36 = vadd.f32 %v1342_v22, %v1248_v14  ;;  %v3276_v39 = vadd.f32 %v1151_v23, %v3262_v15  ;;  %v1159_v26 = vadd.f32 %v3273_v33, %v3267_v25  ;;  %v1254_v35 = vmul.f32 %v3273_v33, %v3273_v33  ;;  %v3282_v50 = vpop.f32.mrb[14].mxu1 }
 0x17d   : > { %4155 = vst [vmem:[#allocation24_spill] sm:$0xff] %v3282_v50  ;;  %v1255_v61 = vmul.f32 %v3282_v50, %v3282_v50  ;;  %v3286_v10 = vpop.f32.mrb[15].mxu1 }
 0x17e   : > { %4156 = vst [vmem:[#allocation25_spill] sm:$0xff] %v3286_v10  ;;  %v3288_v32 = vadd.f32 %v1343_v36, %v1249_v30  ;;  %v1351_v44 = vadd.f32 %v1254_v35, %v1253_v27  ;;  %v1160_v47 = vadd.f32 %v1159_v26, %v3282_v50  ;;  %v3291_v55 = vpop.f32.mrb[16].mxu0  ;;  %v1256_v60 = vmul.f32 %v3286_v10, %v3286_v10 }
 0x17f   : > { %4157 = vst [vmem:[#allocation26_spill] sm:$0xff] %v3291_v55  ;;  %v1260_v56 = vmul.f32 %v3291_v55, %v3291_v55  ;;  %v3297_v62 = vpop.f32.mrb[17].mxu0 }
 0x180   : > { %4158 = vst [vmem:[#allocation27_spill] sm:$0xff] %v3297_v62  ;;  %v1352_v4 = vadd.f32 %v1351_v44, %v1255_v61  ;;  %v3300_v7 = vadd.f32 %v1160_v47, %v3286_v10  ;;  %v1168_v9 = vadd.f32 %v3297_v62, %v3291_v55  ;;  %v1261_v14 = vmul.f32 %v3297_v62, %v3297_v62  ;;  %v3306_v22 = vpop.f32.mrb[16].mxu1 }
 0x181   : > { %4159 = vst [vmem:[#allocation28_spill] sm:$0xff] %v3306_v22  ;;  %v1262_v23 = vmul.f32 %v3306_v22, %v3306_v22  ;;  %v3310_v27 = vpop.f32.mrb[17].mxu1 }
 0x182   : > { %4160 = vst [vmem:[#allocation29_spill] sm:$0xff] %v3310_v27  ;;  %v3312_v30 = vadd.f32 %v1352_v4, %v1256_v60  ;;  %v1360_v36 = vadd.f32 %v1261_v14, %v1260_v56  ;;  %v1169_v26 = vadd.f32 %v1168_v9, %v3306_v22  ;;  %v3315_v35 = vpop.f32.mrb[18].mxu0  ;;  %v1263_v44 = vmul.f32 %v3310_v27, %v3310_v27 }
 0x183   : > { %4161 = vst [vmem:[#allocation30_spill] sm:$0xff] %v3315_v35  ;;  %v1267_v61 = vmul.f32 %v3315_v35, %v3315_v35  ;;  %v3321_v47 = vpop.f32.mrb[19].mxu0 }
 0x184   : > { %4162 = vst [vmem:[#allocation31_spill] sm:$0xff] %v3321_v47  ;;  %v1361_v62 = vadd.f32 %v1360_v36, %v1262_v23  ;;  %v3324_v55 = vadd.f32 %v1169_v26, %v3310_v27  ;;  %v1177_v60 = vadd.f32 %v3321_v47, %v3315_v35  ;;  %v1268_v56 = vmul.f32 %v3321_v47, %v3321_v47  ;;  %v3330_v4 = vpop.f32.mrb[18].mxu1 }
 0x185   : > { %4163 = vst [vmem:[#allocation32_spill] sm:$0xff] %v3330_v4  ;;  %v1269_v9 = vmul.f32 %v3330_v4, %v3330_v4  ;;  %v3334_v14 = vpop.f32.mrb[19].mxu1 }
 0x186   : > { %4164 = vst [vmem:[#allocation33_spill] sm:$0xff] %v3334_v14  ;;  %v3336_v22 = vadd.f32 %v1361_v62, %v1263_v44  ;;  %v1369_v10 = vadd.f32 %v1268_v56, %v1267_v61  ;;  %v1178_v23 = vadd.f32 %v1177_v60, %v3330_v4  ;;  %v3339_v36 = vpop.f32.mrb[20].mxu0  ;;  %v1270_v27 = vmul.f32 %v3334_v14, %v3334_v14 }
 0x187   : > { %4165 = vst [vmem:[#allocation34_spill] sm:$0xff] %v3339_v36  ;;  %v1274_v26 = vmul.f32 %v3339_v36, %v3339_v36  ;;  %v3345_v50 = vpop.f32.mrb[21].mxu0 }
 0x188   : > { %4166 = vst [vmem:[#allocation35_spill] sm:$0xff] %v3345_v50  ;;  %v1370_v33 = vadd.f32 %v1369_v10, %v1269_v9  ;;  %v3348_v25 = vadd.f32 %v1178_v23, %v3334_v14  ;;  %v1186_v62 = vadd.f32 %v3345_v50, %v3339_v36  ;;  %v1275_v61 = vmul.f32 %v3345_v50, %v3345_v50  ;;  %v3354_v44 = vpop.f32.mrb[20].mxu1 }
 0x189   : > { %4167 = vst [vmem:[#allocation36_spill] sm:$0xff] %v3354_v44  ;;  %v1276_v60 = vmul.f32 %v3354_v44, %v3354_v44  ;;  %v3358_v56 = vpop.f32.mrb[21].mxu1 }
 0x18a   : > { %4168 = vst [vmem:[#allocation37_spill] sm:$0xff] %v3358_v56  ;;  %v3360_v15 = vadd.f32 %v1370_v33, %v1270_v27  ;;  %v1378_v12 = vadd.f32 %v1275_v61, %v1274_v26  ;;  %v1187_v10 = vadd.f32 %v1186_v62, %v3354_v44  ;;  %v3363_v9 = vpop.f32.mrb[22].mxu0  ;;  %v1277_v50 = vmul.f32 %v3358_v56, %v3358_v56 }
 0x18b   : > { %4169 = vst [vmem:[#allocation38_spill] sm:$0xff] %v3363_v9  ;;  %v1281_v23 = vmul.f32 %v3363_v9, %v3363_v9  ;;  %v3369_v36 = vpop.f32.mrb[23].mxu0 }
 0x18c   : > { %4170 = vst [vmem:[#allocation39_spill] sm:$0xff] %v3369_v36  ;;  %v1379_v1 = vadd.f32 %v1378_v12, %v1276_v60  ;;  %v3372_v58 = vadd.f32 %v1187_v10, %v3358_v56  ;;  %v1195_v33 = vadd.f32 %v3369_v36, %v3363_v9  ;;  %v1282_v27 = vmul.f32 %v3369_v36, %v3369_v36  ;;  %v3378_v26 = vpop.f32.mrb[22].mxu1 }
 0x18d   : > { %4171 = vst [vmem:[#allocation40_spill] sm:$0xff] %v3378_v26  ;;  %v1283_v62 = vmul.f32 %v3378_v26, %v3378_v26  ;;  %v3382_v61 = vpop.f32.mrb[23].mxu1 }
 0x18e   : > { %4172 = vst [vmem:[#allocation41_spill] sm:$0xff] %v3382_v61  ;;  %v3384_v44 = vadd.f32 %v1379_v1, %v1277_v50  ;;  %v1387_v14 = vadd.f32 %v1282_v27, %v1281_v23  ;;  %v1196_v12 = vadd.f32 %v1195_v33, %v3378_v26  ;;  %v3387_v60 = vpop.f32.mrb[24].mxu0  ;;  %v1284_v1 = vmul.f32 %v3382_v61, %v3382_v61 }
 0x18f   : > { %v1098_v10 = vadd.f32 %v3132_v34, %v3387_v60  ;;  %v1208_v56 = vmul.f32 %v3387_v60, %v3387_v60  ;;  %v3393_v36 = vpop.f32.mrb[25].mxu0 }
 0x190   : > { %v1388_v9 = vadd.f32 %v1387_v14, %v1283_v62  ;;  %v3396_v4 = vadd.f32 %v1196_v12, %v3382_v61  ;;  %v1209_v50 = vmul.f32 %v3393_v36, %v3393_v36  ;;  %v3402_v23 = vpop.f32.mrb[24].mxu1 }
 0x191   : > { %v1210_v34 = vmul.f32 %v3402_v23, %v3402_v23  ;;  %v1038_v33 = vpop.f32.mrb[25].mxu1  ;;  %v1099_v27 = vadd.f32 %v1098_v10, %v3393_v36  ;;  %v1101_v14 = vsel %vm1100_vm1, %v3402_v23, 0.0  ;;  %v1291_v62 = vadd.f32 %v3144_v49, %v1208_v56 }
 0x192   : > { %v3410_v12 = vadd.f32 %v1388_v9, %v1284_v1  ;;  %v3412_v26 = vpop.f32.mrb[26].mxu0 }
 0x193   : > { %v1108_v61 = vadd.f32 %v3156_v59, %v3412_v26  ;;  %v1215_v47 = vmul.f32 %v3412_v26, %v3412_v26  ;;  %v3418_v35 = vpop.f32.mrb[27].mxu0  ;;  %v1102_v33 = vadd.f32 %v1101_v14, %v1099_v27  ;;  %v1292_v51 = vadd.f32 %v1291_v62, %v1209_v50 }
 0x194   : > { %v1216_v10 = vmul.f32 %v3418_v35, %v3418_v35  ;;  %v3422_v45 = vpop.f32.mrb[26].mxu1  ;;  %v1293_v49 = vsel %vm1100_vm1, %v1210_v34, 0.0 }
 0x195   : > { %1103 = vadd.xlane.f32.xlu0 %v1102_v33  ;;  %v1043_v56 = vpop.f32.mrb[27].mxu1  ;;  %v1294_v9 = vadd.f32 %v1293_v49, %v1292_v51  ;;  %v1217_v59 = vmul.f32 %v3422_v45, %v3422_v45  ;;  %v1300_v1 = vadd.f32 %v3168_v3, %v1215_v47  ;;  %v1109_v63 = vadd.f32 %v1108_v61, %v3418_v35 }
 0x196   : > { %v3429_v38 = vpop.f32.mrb[28].mxu0  ;;  %v1110_v50 = vsel %vm1100_vm1, %v3422_v45, 0.0 }
 0x197   : > { %v1117_v27 = vadd.f32 %v3180_v13, %v3429_v38  ;;  %v1222_v34 = vmul.f32 %v3429_v38, %v3429_v38  ;;  %v3437_v14 = vpop.f32.mrb[29].mxu0  ;;  %v1301_v51 = vadd.f32 %v1300_v1, %v1216_v10  ;;  %v1302_v62 = vsel %vm1100_vm1, %v1217_v59, 0.0 }
 0x198   : > { %v1223_v3 = vmul.f32 %v3437_v14, %v3437_v14  ;;  %v3442_v47 = vpop.f32.mrb[28].mxu1  ;;  %v1111_v61 = vadd.f32 %v1110_v50, %v1109_v63 }
 0x199   : > { %v1224_v33 = vmul.f32 %v3442_v47, %v3442_v47  ;;  %1295 = vadd.xlane.f32.xlu0 %v1294_v9  ;;  %v1303_v49 = vadd.f32 %v1302_v62, %v1301_v51  ;;  %v1048_v13 = vpop.f32.mrb[29].mxu1  ;;  %v1118_v56 = vadd.f32 %v1117_v27, %v3437_v14  ;;  %v1119_v42 = vsel %vm1100_vm1, %v3442_v47, 0.0 }
 0x19a   : > { %v3449_v10 = vpop.f32.mrb[30].mxu0  ;;  %v1309_v59 = vadd.f32 %v3192_v20, %v1222_v34 }
 0x19b   : > { %v1126_v1 = vadd.f32 %v3204_v31, %v3449_v10  ;;  %v1229_v63 = vmul.f32 %v3449_v10, %v3449_v10  ;;  %1304 = vadd.xlane.f32.xlu1 %v1303_v49  ;;  %v3456_v50 = vpop.f32.mrb[31].mxu0  ;;  %v1120_v9 = vadd.f32 %v1119_v42, %v1118_v56  ;;  %v1311_v51 = vsel %vm1100_vm1, %v1224_v33, 0.0 }
 0x19c   : > { %v1230_v27 = vmul.f32 %v3456_v50, %v3456_v50  ;;  %v3461_v62 = vpop.f32.mrb[30].mxu1  ;;  %v1310_v13 = vadd.f32 %v1309_v59, %v1223_v3 }
 0x19d   : > { %v1231_v20 = vmul.f32 %v3461_v62, %v3461_v62  ;;  %1112 = vadd.xlane.f32.xlu0 %v1111_v61  ;;  %v1053_v31 = vpop.f32.mrb[31].mxu1  ;;  %v1127_v34 = vadd.f32 %v1126_v1, %v3456_v50  ;;  %v1128_v49 = vsel %vm1100_vm1, %v3461_v62, 0.0  ;;  %v1318_v42 = vadd.f32 %v3216_v43, %v1229_v63 }
 0x19e   : > { %v3469_v56 = vpop.f32.mrb[32].mxu0  ;;  %v1312_v33 = vadd.f32 %v1311_v51, %v1310_v13 }
 0x19f   : > { %v1135_v37 = vadd.f32 %v3228_v19, %v3469_v56  ;;  %v1236_v3 = vmul.f32 %v3469_v56, %v3469_v56  ;;  %1121 = vadd.xlane.f32.xlu1 %v1120_v9  ;;  %v3475_v59 = vpop.f32.mrb[33].mxu0  ;;  %v1129_v61 = vadd.f32 %v1128_v49, %v1127_v34  ;;  %v1319_v31 = vadd.f32 %v1318_v42, %v1230_v27 }
 0x1a0   : > { %v1237_v1 = vmul.f32 %v3475_v59, %v3475_v59  ;;  %v3479_v29 = vpop.f32.mrb[32].mxu1  ;;  %v1320_v43 = vsel %vm1100_vm1, %v1231_v20, 0.0 }
 0x1a1   : > { %4173 = vst [vmem:[#allocation42_spill] sm:$0xff] %v3479_v29  ;;  %v1238_v63 = vmul.f32 %v3479_v29, %v3479_v29  ;;  %1313 = vadd.xlane.f32.xlu0 %v1312_v33  ;;  %v1058_v19 = vpop.f32.mrb[33].mxu1  ;;  %v1136_v51 = vadd.f32 %v1135_v37, %v3475_v59  ;;  %v1137_v9 = vsel %vm1100_vm1, %v3479_v29, 0.0  ;;  %v1321_v13 = vadd.f32 %v1320_v43, %v1319_v31 }
 0x1a2   : > { %v3487_v34 = vpop.f32.mrb[34].mxu0  ;;  %v1327_v27 = vadd.f32 %v3240_v53, %v1236_v3 }
 0x1a3   : > { %v1144_v49 = vadd.f32 %v3252_v5, %v3487_v34  ;;  %v1243_v20 = vmul.f32 %v3487_v34, %v3487_v34  ;;  %1130 = vadd.xlane.f32.xlu1 %v1129_v61  ;;  %v3494_v42 = vpop.f32.mrb[35].mxu0  ;;  %v1138_v33 = vadd.f32 %v1137_v9, %v1136_v51  ;;  %v1329_v37 = vsel %vm1100_vm1, %v1238_v63, 0.0 }
 0x1a4   : > { %v1244_v19 = vmul.f32 %v3494_v42, %v3494_v42  ;;  %v3499_v31 = vpop.f32.mrb[34].mxu1  ;;  %v1328_v43 = vadd.f32 %v1327_v27, %v1237_v1 }
 0x1a5   : > { %4174 = vst [vmem:[#allocation43_spill] sm:$0xff] %v3499_v31  ;;  %v1245_v53 = vmul.f32 %v3499_v31, %v3499_v31  ;;  %1139 = vadd.xlane.f32.xlu0 %v1138_v33  ;;  %v1063_v5 = vpop.f32.mrb[35].mxu1  ;;  %v1145_v3 = vadd.f32 %v1144_v49, %v3494_v42  ;;  %v1146_v61 = vsel %vm1100_vm1, %v3499_v31, 0.0  ;;  %v1336_v51 = vadd.f32 %v3264_v17, %v1243_v20 }
 0x1a6   : > { %v3507_v9 = vpop.f32.mrb[36].mxu0  ;;  %v1330_v63 = vadd.f32 %v1329_v37, %v1328_v43 }
 0x1a7   : > { %4175 = vst [vmem:[#allocation44_spill] sm:$0xff] %v3507_v9  ;;  %v1153_v29 = vadd.f32 %v3276_v39, %v3507_v9  ;;  %v1250_v1 = vmul.f32 %v3507_v9, %v3507_v9  ;;  %1322 = vadd.xlane.f32.xlu1 %v1321_v13  ;;  %v3513_v27 = vpop.f32.mrb[37].mxu0  ;;  %v1147_v33 = vadd.f32 %v1146_v61, %v1145_v3  ;;  %v1338_v17 = vsel %vm1100_vm1, %v1245_v53, 0.0 }
 0x1a8   : > { %4176 = vst [vmem:[#allocation45_spill] sm:$0xff] %v3513_v27  ;;  %v1337_v5 = vadd.f32 %v1336_v51, %v1244_v19  ;;  %v1251_v49 = vmul.f32 %v3513_v27, %v3513_v27  ;;  %v3517_v31 = vpop.f32.mrb[36].mxu1 }
 0x1a9   : > { %4177 = vst [vmem:[#allocation46_spill] sm:$0xff] %v3517_v31  ;;  %v1252_v20 = vmul.f32 %v3517_v31, %v3517_v31  ;;  %1331 = vadd.xlane.f32.xlu0 %v1330_v63  ;;  %v1068_v39 = vpop.f32.mrb[37].mxu1  ;;  %v1154_v37 = vadd.f32 %v1153_v29, %v3513_v27  ;;  %v1155_v13 = vsel %vm1100_vm1, %v3517_v31, 0.0  ;;  %v1345_v19 = vadd.f32 %v3288_v32, %v1250_v1 }
 0x1aa   : > { %v1339_v43 = vadd.f32 %v1338_v17, %v1337_v5  ;;  %v3525_v3 = vpop.f32.mrb[38].mxu0 }
 0x1ab   : > { %4178 = vst [vmem:[#allocation47_spill] sm:$0xff] %v3525_v3  ;;  %v1162_v61 = vadd.f32 %v3300_v7, %v3525_v3  ;;  %v1257_v53 = vmul.f32 %v3525_v3, %v3525_v3  ;;  %1148 = vadd.xlane.f32.xlu1 %v1147_v33  ;;  %v3532_v51 = vpop.f32.mrb[39].mxu0  ;;  %v1156_v63 = vadd.f32 %v1155_v13, %v1154_v37  ;;  %v1347_v29 = vsel %vm1100_vm1, %v1252_v20, 0.0 }
 0x1ac   : > { %4179 = vst [vmem:[#allocation48_spill] sm:$0xff] %v3532_v51  ;;  %v1258_v39 = vmul.f32 %v3532_v51, %v3532_v51  ;;  %v3537_v5 = vpop.f32.mrb[38].mxu1  ;;  %v1346_v17 = vadd.f32 %v1345_v19, %v1251_v49 }
 0x1ad   : > { %4180 = vst [vmem:[#allocation49_spill] sm:$0xff] %v3537_v5  ;;  %v1259_v32 = vmul.f32 %v3537_v5, %v3537_v5  ;;  %1157 = vadd.xlane.f32.xlu0 %v1156_v63  ;;  %v1073_v7 = vpop.f32.mrb[39].mxu1  ;;  %v1163_v1 = vadd.f32 %v1162_v61, %v3532_v51  ;;  %v1164_v33 = vsel %vm1100_vm1, %v3537_v5, 0.0  ;;  %v1354_v37 = vadd.f32 %v3312_v30, %v1257_v53 }
 0x1ae   : > { %v3545_v13 = vpop.f32.mrb[40].mxu0  ;;  %v1348_v20 = vadd.f32 %v1347_v29, %v1346_v17 }
 0x1af   : > { %4181 = vst [vmem:[#allocation50_spill] sm:$0xff] %v3545_v13  ;;  %v1171_v3 = vadd.f32 %v3324_v55, %v3545_v13  ;;  %v1264_v49 = vmul.f32 %v3545_v13, %v3545_v13  ;;  %1340 = vadd.xlane.f32.xlu1 %v1339_v43  ;;  %v3551_v19 = vpop.f32.mrb[41].mxu0  ;;  %v1165_v63 = vadd.f32 %v1164_v33, %v1163_v1  ;;  %v1356_v30 = vsel %vm1100_vm1, %v1259_v32, 0.0 }
 0x1b0   : > { %4182 = vst [vmem:[#allocation51_spill] sm:$0xff] %v3551_v19  ;;  %v1355_v7 = vadd.f32 %v1354_v37, %v1258_v39  ;;  %v1265_v61 = vmul.f32 %v3551_v19, %v3551_v19  ;;  %v3555_v5 = vpop.f32.mrb[40].mxu1 }
 0x1b1   : > { %4183 = vst [vmem:[#allocation52_spill] sm:$0xff] %v3555_v5  ;;  %v1266_v53 = vmul.f32 %v3555_v5, %v3555_v5  ;;  %1349 = vadd.xlane.f32.xlu0 %v1348_v20  ;;  %v1078_v55 = vpop.f32.mrb[41].mxu1  ;;  %v1172_v29 = vadd.f32 %v1171_v3, %v3551_v19  ;;  %v1173_v43 = vsel %vm1100_vm1, %v3555_v5, 0.0  ;;  %v1363_v39 = vadd.f32 %v3336_v22, %v1264_v49 }
 0x1b2   : > { %v1357_v17 = vadd.f32 %v1356_v30, %v1355_v7  ;;  %v3563_v1 = vpop.f32.mrb[42].mxu0 }
 0x1b3   : > { %v1180_v33 = vadd.f32 %v3348_v25, %v3563_v1  ;;  %v1271_v32 = vmul.f32 %v3563_v1, %v3563_v1  ;;  %1166 = vadd.xlane.f32.xlu1 %v1165_v63  ;;  %v3570_v37 = vpop.f32.mrb[43].mxu0  ;;  %v1174_v20 = vadd.f32 %v1173_v43, %v1172_v29  ;;  %v1365_v3 = vsel %vm1100_vm1, %v1266_v53, 0.0 }
 0x1b4   : > { %v1272_v55 = vmul.f32 %v3570_v37, %v3570_v37  ;;  %v3575_v7 = vpop.f32.mrb[42].mxu1  ;;  %v1364_v30 = vadd.f32 %v1363_v39, %v1265_v61 }
 0x1b5   : > { %4184 = vst [vmem:[#allocation53_spill] sm:$0xff] %v3575_v7  ;;  %v1273_v22 = vmul.f32 %v3575_v7, %v3575_v7  ;;  %1175 = vadd.xlane.f32.xlu0 %v1174_v20  ;;  %v1083_v25 = vpop.f32.mrb[43].mxu1  ;;  %v1181_v49 = vadd.f32 %v1180_v33, %v3570_v37  ;;  %v1182_v63 = vsel %vm1100_vm1, %v3575_v7, 0.0  ;;  %v1372_v29 = vadd.f32 %v3360_v15, %v1271_v32 }
 0x1b6   : > { %v3583_v43 = vpop.f32.mrb[44].mxu0  ;;  %v1366_v53 = vadd.f32 %v1365_v3, %v1364_v30 }
 0x1b7   : > { %4185 = vst [vmem:[#allocation54_spill] sm:$0xff] %v3583_v43  ;;  %v1189_v5 = vadd.f32 %v3372_v58, %v3583_v43  ;;  %v1278_v61 = vmul.f32 %v3583_v43, %v3583_v43  ;;  %1358 = vadd.xlane.f32.xlu1 %v1357_v17  ;;  %v3589_v39 = vpop.f32.mrb[45].mxu0  ;;  %v1183_v20 = vadd.f32 %v1182_v63, %v1181_v49  ;;  %v1374_v15 = vsel %vm1100_vm1, %v1273_v22, 0.0 }
 0x1b8   : > { %4186 = vst [vmem:[#allocation55_spill] sm:$0xff] %v3589_v39  ;;  %v1373_v25 = vadd.f32 %v1372_v29, %v1272_v55  ;;  %v1279_v33 = vmul.f32 %v3589_v39, %v3589_v39  ;;  %v3593_v19 = vpop.f32.mrb[44].mxu1 }
 0x1b9   : > { %4187 = vst [vmem:[#allocation56_spill] sm:$0xff] %v3593_v19  ;;  %v1280_v32 = vmul.f32 %v3593_v19, %v3593_v19  ;;  %1367 = vadd.xlane.f32.xlu0 %v1366_v53  ;;  %v1088_v58 = vpop.f32.mrb[45].mxu1  ;;  %v1190_v3 = vadd.f32 %v1189_v5, %v3589_v39  ;;  %v1191_v17 = vsel %vm1100_vm1, %v3593_v19, 0.0  ;;  %v1381_v55 = vadd.f32 %v3384_v44, %v1278_v61 }
 0x1ba   : > { %v1375_v30 = vadd.f32 %v1374_v15, %v1373_v25  ;;  %v3601_v49 = vpop.f32.mrb[46].mxu0  ;;  %v2677_v58 = vmov 0  }
 0x1bb   : > { %4188 = vst [vmem:[#allocation57_spill] sm:$0xff] %v3601_v49  ;;  %v1198_v63 = vadd.f32 %v3396_v4, %v3601_v49  ;;  %v1285_v22 = vmul.f32 %v3601_v49, %v3601_v49  ;;  %1184 = vadd.xlane.f32.xlu1 %v1183_v20  ;;  %v3608_v29 = vpop.f32.mrb[47].mxu0  ;;  %v1192_v53 = vadd.f32 %v1191_v17, %v1190_v3  ;;  %v1383_v5 = vsel %vm1100_vm1, %v1280_v32, 0.0 }
 0x1bc   : > { %4189 = vst [vmem:[#allocation58_spill] sm:$0xff] %v3608_v29  ;;  %2516 = vset.pattern.permute.xlu0 %v2677_v58  ;;  %v1286_v25 = vmul.f32 %v3608_v29, %v3608_v29  ;;  %v3613_v15 = vpop.f32.mrb[46].mxu1  ;;  %v1382_v44 = vadd.f32 %v1381_v55, %v1279_v33  ;;  %2517 = vset.pattern.permute.xlu1 %v2677_v58 }
 0x1bd   : > { %4190 = vst [vmem:[#allocation59_spill] sm:$0xff] %v3613_v15  ;;  %v1199_v4 = vadd.f32 %v1198_v63, %v3608_v29  ;;  %v1287_v61 = vmul.f32 %v3613_v15, %v3613_v15  ;;  %1193 = vadd.xlane.f32.xlu0 %v1192_v53  ;;  %v1200_v20 = vsel %vm1100_vm1, %v3613_v15, 0.0  ;;  %v1390_v32 = vadd.f32 %v3410_v12, %v1285_v22  ;;  %v1093_v3 = vpop.f32.mrb[47].mxu1 }
 0x1be   : > { %v1384_v17 = vadd.f32 %v1383_v5, %v1382_v44 }
 0x1bf   : > { %1376 = vadd.xlane.f32.xlu1 %v1375_v30  ;;  %v1201_v19 = vadd.f32 %v1200_v20, %v1199_v4  ;;  %v1391_v39 = vadd.f32 %v1390_v32, %v1286_v25  ;;  %v1392_v43 = vsel %vm1100_vm1, %v1287_v61, 0.0 }
 0x1c1   : > { %1385 = vadd.xlane.f32.xlu0 %v1384_v17  ;;  %v1393_v33 = vadd.f32 %v1392_v43, %v1391_v39 }
 0x1c3   : > { %1202 = vadd.xlane.f32.xlu1 %v1201_v19 }
 0x1c7   : > { %1394 = vadd.xlane.f32.xlu1 %v1393_v33 }
 0x222   : > { %v1104_v55 = vpop.xlane.xlu0 %1103 }
 0x223   : > { %v1396_v63 = vmul.f32 0.0012755102, %v1104_v55 }
 0x225   : > { %v1420_v58 = vmul.f32 %v1396_v63, %v1396_v63 }
 0x226   : > { %v1296_v53 = vpop.xlane.xlu0 %1295 }
 0x227   : > { %v1408_v13 = vmul.f32 0.0012755102, %v1296_v53  ;;  %v1444_v53 = vld [vmem:[%s3634_s13] sm:$0xff] }
 0x228   : > { %v1305_v15 = vpop.xlane.xlu1 %1304 }
 0x229   : > { %v1432_v29 = vsub.f32 %v1408_v13, %v1420_v58  ;;  %v1409_v25 = vmul.f32 0.0012755102, %v1305_v15 }
 0x22a   : > { %v1113_v12 = vpop.xlane.xlu0 %1112 }
 0x22b   : > { %v1456_v22 = vadd.f32 1e-05, %v1432_v29  ;;  %v1397_v30 = vmul.f32 0.0012755102, %v1113_v12 }
 0x22c   : > { %v1122_v5 = vpop.xlane.xlu1 %1121 }
 0x22d   : > { %2518 = vrsqrt.f32 %v1456_v22  ;;  %v1421_v44 = vmul.f32 %v1397_v30, %v1397_v30  ;;  %v3622_v4 = vmul.f32 0.0012755102, %v1122_v5 }
 0x22e   : > { %v1314_v19 = vpop.xlane.xlu0 %1313 }
 0x22f   : > { %v1433_v43 = vsub.f32 %v1409_v25, %v1421_v44  ;;  %v1422_v39 = vmul.f32 %v3622_v4, %v3622_v4  ;;  %v1410_v61 = vmul.f32 0.0012755102, %v1314_v19 }
 0x230   : > { %v1131_v20 = vpop.xlane.xlu1 %1130 }
 0x231   : > { %v1457_v32 = vadd.f32 1e-05, %v1433_v43  ;;  %v1434_v13 = vsub.f32 %v1410_v61, %v1422_v39  ;;  %v3627_v3 = vmul.f32 0.0012755102, %v1131_v20  ;;  %v1445_v20 = vld [vmem:[%s3634_s13 + $0x8] sm:$0xff] }
 0x232   : > { %v1140_v29 = vpop.xlane.xlu0 %1139 }
 0x233   : > { %2520 = vrsqrt.f32 %v1457_v32  ;;  %v1458_v17 = vadd.f32 1e-05, %v1434_v13  ;;  %v1423_v33 = vmul.f32 %v3627_v3, %v3627_v3  ;;  %v3639_v22 = vmul.f32 0.0012755102, %v1140_v29 }
 0x234   : > { %v1323_v15 = vpop.xlane.xlu1 %1322 }
 0x235   : > { %v1411_v55 = vmul.f32 0.0012755102, %v1323_v15  ;;  %2522 = vrsqrt.f32 %v1458_v17  ;;  %v1424_v32 = vmul.f32 %v3639_v22, %v3639_v22 }
 0x236   : > { %v1332_v58 = vpop.xlane.xlu0 %1331 }
 0x237   : > { %v2519_v12 = vpop.eup %2518  ;;  %v1435_v5 = vsub.f32 %v1411_v55, %v1423_v33  ;;  %v1412_v43 = vmul.f32 0.0012755102, %v1332_v58 }
 0x238   : > { %v1149_v25 = vpop.xlane.xlu1 %1148  ;;  %v1480_v44 = vmul.f32 %v2519_v12, %v1444_v53 }
 0x239   : > { %v1459_v19 = vadd.f32 1e-05, %v1435_v5  ;;  %v3641_v39 = vmul.f32 0.0012755102, %v1149_v25  ;;  %v1436_v15 = vsub.f32 %v1412_v43, %v1424_v32  ;;  %v1493_v5 = vld [vmem:[%s3651_s10 + $0x8] sm:$0xff]  ;;  %v1492_v25 = vld [vmem:[%s3651_s10] sm:$0xff] }
 0x23a   : > { %v1158_v61 = vpop.xlane.xlu0 %1157  ;;  %1530 = vperm.xlu0 %2516, %v1480_v44   ;;  %v1504_v58 = vmul.f32 %v1480_v44, %v1396_v63  ;;  %v1446_v63 = vld [vmem:[%s3634_s13 + $0x10] sm:$0xff]  ;;  %v1447_v44 = vld [vmem:[%s3634_s13 + $0x18] sm:$0xff] }
 0x23b   : > { %2524 = vrsqrt.f32 %v1459_v19  ;;  %v1425_v17 = vmul.f32 %v3641_v39, %v3641_v39  ;;  %v1460_v51 = vadd.f32 1e-05, %v1436_v15 }
 0x23c   : > { %v1341_v13 = vpop.xlane.xlu1 %1340  ;;  %v1516_v9 = vsub.f32 %v1492_v25, %v1504_v58  ;;  %v1495_v58 = vld [vmem:[%s3651_s10 + $0x18] sm:$0xff] }
 0x23d   : > { %v2521_v29 = vpop.eup %2520  ;;  %v1413_v33 = vmul.f32 0.0012755102, %v1341_v13  ;;  %v3659_v13 = vmul.f32 0.0012755102, %v1158_v61 }
 0x23e   : > { %v1481_v55 = vmul.f32 %v2521_v29, %v1445_v20  ;;  %v1350_v53 = vpop.xlane.xlu0 %1349 }
 0x23f   : > { %v1437_v12 = vsub.f32 %v1413_v33, %v1425_v17  ;;  %v2523_v7 = vpop.eup %2522  ;;  %v1414_v29 = vmul.f32 0.0012755102, %v1350_v53 }
 0x240   : > { %v1505_v19 = vmul.f32 %v1481_v55, %v1397_v30  ;;  %v1167_v49 = vpop.xlane.xlu1 %1166  ;;  %1535 = vperm.xlu1 %2517, %v1481_v55   ;;  %v1482_v33 = vmul.f32 %v2523_v7, %v1446_v63  ;;  %v1494_v7 = vld [vmem:[%s3651_s10 + $0x10] sm:$0xff]  ;;  %v1449_v63 = vld [vmem:[%s3634_s13 + $0x28] sm:$0xff] }
 0x241   : > { %v1461_v31 = vadd.f32 1e-05, %v1437_v12  ;;  %v3657_v27 = vmul.f32 0.0012755102, %v1167_v49 }
 0x242   : > { %v1176_v43 = vpop.xlane.xlu0 %1175  ;;  %v1517_v32 = vsub.f32 %v1493_v5, %v1505_v19  ;;  %v1506_v19 = vmul.f32 %v1482_v33, %v3622_v4 }
 0x243   : > { %2526 = vrsqrt.f32 %v1461_v31  ;;  %v1427_v49 = vmul.f32 %v3657_v27, %v3657_v27  ;;  %v1426_v31 = vmul.f32 %v3659_v13, %v3659_v13 }
 0x244   : > { %v1359_v20 = vpop.xlane.xlu1 %1358  ;;  %1679 = vperm.xlu0 %2516, %v1517_v32   ;;  %1674 = vperm.xlu1 %2517, %v1516_v9   ;;  %2528 = vrsqrt.f32 %v1460_v51  ;;  %v3672_v32 = vmul.f32 0.0012755102, %v1176_v43 }
 0x245   : > { %v2525_v30 = vpop.eup %2524  ;;  %v1415_v15 = vmul.f32 0.0012755102, %v1359_v20  ;;  %v1438_v51 = vsub.f32 %v1414_v29, %v1426_v31  ;;  %v1518_v31 = vsub.f32 %v1494_v7, %v1506_v19 }
 0x246   : > { %v1368_v17 = vpop.xlane.xlu0 %1367  ;;  %v1483_v61 = vmul.f32 %v2525_v30, %v1447_v44 }
 0x247   : > { %v1439_v55 = vsub.f32 %v1415_v15, %v1427_v49  ;;  %v1416_v29 = vmul.f32 0.0012755102, %v1368_v17 }
 0x248   : > { %v1185_v12 = vpop.xlane.xlu1 %1184  ;;  %1540 = vperm.xlu1 %2517, %v1482_v33   ;;  %v1507_v9 = vmul.f32 %v1483_v61, %v3627_v3  ;;  %v1462_v3 = vadd.f32 1e-05, %v1438_v51  ;;  %v1428_v33 = vmul.f32 %v3672_v32, %v3672_v32 }
 0x249   : > { %v1463_v53 = vadd.f32 1e-05, %v1439_v55  ;;  %v3669_v5 = vmul.f32 0.0012755102, %v1185_v12  ;;  %v1448_v12 = vld [vmem:[%s3634_s13 + $0x20] sm:$0xff] }
 0x24a   : > { %v1519_v25 = vsub.f32 %v1495_v58, %v1507_v9  ;;  %v1194_v44 = vpop.xlane.xlu0 %1193  ;;  %v1497_v58 = vld [vmem:[%s3651_s10 + $0x28] sm:$0xff]  ;;  %v1440_v17 = vsub.f32 %v1416_v29, %v1428_v33 }
 0x24b   : > { %2530 = vrsqrt.f32 %v1463_v53  ;;  %v1429_v49 = vmul.f32 %v3669_v5, %v3669_v5  ;;  %v3683_v7 = vmul.f32 0.0012755102, %v1194_v44 }
 0x24c   : > { %v1377_v20 = vpop.xlane.xlu1 %1376  ;;  %1689 = vperm.xlu0 %2516, %v1519_v25   ;;  %1545 = vperm.xlu1 %2517, %v1483_v61   ;;  %2532 = vrsqrt.f32 %v1462_v3 }
 0x24d   : > { %v2527_v30 = vpop.eup %2526  ;;  %v1417_v15 = vmul.f32 0.0012755102, %v1377_v20  ;;  %v1430_v44 = vmul.f32 %v3683_v7, %v3683_v7 }
 0x24e   : > { %v1485_v4 = vmul.f32 %v2527_v30, %v1449_v63  ;;  %v2529_v43 = vpop.eup %2528  ;;  %v1386_v25 = vpop.xlane.xlu0 %1385  ;;  %v1451_v63 = vld [vmem:[%s3634_s13 + $0x38] sm:$0xff] }
 0x24f   : > { %v1441_v55 = vsub.f32 %v1417_v15, %v1429_v49  ;;  %v1484_v19 = vmul.f32 %v2529_v43, %v1448_v12  ;;  %v1464_v15 = vadd.f32 1e-05, %v1440_v17 }
 0x250   : > { %1684 = vperm.xlu1 %2517, %v1518_v31   ;;  %v1203_v9 = vpop.xlane.xlu1 %1202  ;;  %v1509_v61 = vmul.f32 %v1485_v4, %v3641_v39  ;;  %v1418_v31 = vmul.f32 0.0012755102, %v1386_v25 }
 0x251   : > { %v1465_v51 = vadd.f32 1e-05, %v1441_v55  ;;  %v1407_v53 = vmul.f32 0.0012755102, %v1203_v9  ;;  %v1508_v33 = vmul.f32 %v1484_v19, %v3639_v22  ;;  %v1499_v55 = vld [vmem:[%s3651_s10 + $0x38] sm:$0xff]  ;;  %v1450_v22 = vld [vmem:[%s3634_s13 + $0x30] sm:$0xff] }
 0x252   : > { %v1521_v20 = vsub.f32 %v1497_v58, %v1509_v61  ;;  %v1496_v58 = vld [vmem:[%s3651_s10 + $0x20] sm:$0xff]  ;;  %v1442_v9 = vsub.f32 %v1418_v31, %v1430_v44 }
 0x253   : > { %2534 = vrsqrt.f32 %v1465_v51  ;;  %v1431_v39 = vmul.f32 %v1407_v53, %v1407_v53  ;;  %v1520_v51 = vsub.f32 %v1496_v58, %v1508_v33  ;;  %v1455_v33 = vld [vmem:[%s3634_s13 + $0x58] sm:$0xff]  ;;  %v1452_v44 = vld [vmem:[%s3634_s13 + $0x40] sm:$0xff] }
 0x254   : > { %1699 = vperm.xlu0 %2516, %v1521_v20   ;;  %1550 = vperm.xlu1 %2517, %v1484_v19   ;;  %v1395_v30 = vpop.xlane.xlu1 %1394  ;;  %2536 = vrsqrt.f32 %v1464_v15  ;;  %v1453_v20 = vld [vmem:[%s3634_s13 + $0x48] sm:$0xff] }
 0x255   : > { %v2531_v49 = vpop.eup %2530  ;;  %v1419_v3 = vmul.f32 0.0012755102, %v1395_v30 }
 0x256   : > { %v1487_v29 = vmul.f32 %v2531_v49, %v1451_v63  ;;  %v2533_v25 = vpop.eup %2532  ;;  %v1466_v63 = vadd.f32 1e-05, %v1442_v9  ;;  %v1503_v9 = vld [vmem:[%s3651_s10 + $0x58] sm:$0xff] }
 0x257   : > { %v1443_v43 = vsub.f32 %v1419_v3, %v1431_v39  ;;  %v1486_v30 = vmul.f32 %v2533_v25, %v1450_v22  ;;  %v1498_v3 = vld [vmem:[%s3651_s10 + $0x30] sm:$0xff] }
 0x258   : > { %1555 = vperm.xlu1 %2517, %v1485_v4   ;;  %v1511_v12 = vmul.f32 %v1487_v29, %v3657_v27  ;;  %v1501_v27 = vld [vmem:[%s3651_s10 + $0x48] sm:$0xff]  ;;  %v1454_v25 = vld [vmem:[%s3634_s13 + $0x50] sm:$0xff] }
 0x259   : > { %v1467_v61 = vadd.f32 1e-05, %v1443_v43  ;;  %v1510_v31 = vmul.f32 %v1486_v30, %v3659_v13 }
 0x25a   : > { %v1523_v17 = vsub.f32 %v1499_v55, %v1511_v12 }
 0x25b   : > { %2538 = vrsqrt.f32 %v1467_v61  ;;  %v1522_v55 = vsub.f32 %v1498_v3, %v1510_v31  ;;  %v1823_v3 = vld [vmem:[%s2859_s16 + $0x38] sm:$0xff] }
 0x25c   : > { %1709 = vperm.xlu0 %2516, %v1523_v17   ;;  %1694 = vperm.xlu1 %2517, %v1520_v51   ;;  %2540 = vrsqrt.f32 %v1466_v63  ;;  %v1500_v51 = vld [vmem:[%s3651_s10 + $0x40] sm:$0xff] }
 0x25d   : > { %v2535_v19 = vpop.eup %2534 }
 0x25e   : > { %v1489_v4 = vmul.f32 %v2535_v19, %v1453_v20  ;;  %v2537_v39 = vpop.eup %2536  ;;  %v1502_v19 = vld [vmem:[%s3651_s10 + $0x50] sm:$0xff] }
 0x25f   : > { %v1488_v12 = vmul.f32 %v2537_v39, %v1452_v44  ;;  %v1825_v44 = vld [vmem:[%s2859_s16 + $0x48] sm:$0xff] }
 0x260   : > { %1575 = vperm.xlu0 %2516, %v1489_v4   ;;  %1560 = vperm.xlu1 %2517, %v1486_v30   ;;  %v1513_v49 = vmul.f32 %v1489_v4, %v3669_v5 }
 0x261   : > { %v1512_v13 = vmul.f32 %v1488_v12, %v3672_v32 }
 0x262   : > { %v1525_v15 = vsub.f32 %v1501_v27, %v1513_v49 }
 0x263   : > { %v1524_v20 = vsub.f32 %v1500_v51, %v1512_v13 }
 0x264   : > { %1719 = vperm.xlu0 %2516, %v1525_v15   ;;  %1565 = vperm.xlu1 %2517, %v1487_v29  }
 0x265   : > { %v2539_v43 = vpop.eup %2538 }
 0x266   : > { %v1491_v58 = vmul.f32 %v2539_v43, %v1455_v33  ;;  %v2541_v17 = vpop.eup %2540  ;;  %v1826_v43 = vld [vmem:[%s2859_s16 + $0x50] sm:$0xff] }
 0x267   : > { %v1490_v22 = vmul.f32 %v2541_v17, %v1454_v25  ;;  %v1816_v25 = vld [vmem:[%s2859_s16] sm:$0xff] }
 0x268   : > { %1704 = vperm.xlu1 %2517, %v1522_v55   ;;  %1585 = vperm.xlu0 %2516, %v1491_v58   ;;  %v1515_v5 = vmul.f32 %v1491_v58, %v1407_v53 }
 0x269   : > { %v1514_v29 = vmul.f32 %v1490_v22, %v3683_v7 }
 0x26a   : > { %v1527_v61 = vsub.f32 %v1503_v9, %v1515_v5 }
 0x26b   : > { %v1526_v63 = vsub.f32 %v1502_v19, %v1514_v29 }
 0x26c   : > { %1570 = vperm.xlu1 %2517, %v1488_v12   ;;  %1729 = vperm.xlu0 %2516, %v1527_v61  }
 0x270   : > { %1714 = vperm.xlu1 %2517, %v1524_v20   ;;  %v1817_v20 = vld [vmem:[%s2859_s16 + $0x8] sm:$0xff] }
 0x274   : > { %1580 = vperm.xlu1 %2517, %v1490_v22   ;;  %v1818_v22 = vld [vmem:[%s2859_s16 + $0x10] sm:$0xff] }
 0x278   : > { %1724 = vperm.xlu1 %2517, %v1526_v63  }
 0x2b9   : > { %v1531_v4 = vpop.permute.xlu0 %1530 }
 0x2ba   : > { %v1588_v32 = vmul.f32 %v1531_v4, %v3106_v41  ;;  %v1589_v30 = vmul.f32 %v1531_v4, %v3110_v28  ;;  %v1590_v27 = vmul.f32 %v1531_v4, %v3116_v40  ;;  %v1591_v49 = vmul.f32 %v1531_v4, %v3120_v52 }
 0x2bb   : > { %v1592_v7 = vmul.f32 %v1531_v4, %v3387_v60  ;;  %v1593_v15 = vmul.f32 %v1531_v4, %v3393_v36  ;;  %v1594_v40 = vmul.f32 %v1531_v4, %v3402_v23  ;;  %v1824_v36 = vld [vmem:[%s2859_s16 + $0x40] sm:$0xff]  ;;  %v1819_v4 = vld [vmem:[%s2859_s16 + $0x18] sm:$0xff] }
 0x2bf   : > { %v1536_v53 = vpop.permute.xlu1 %1535 }
 0x2c0   : > { %v1595_v31 = vmul.f32 %v1536_v53, %v3123_v8  ;;  %v1596_v39 = vmul.f32 %v1536_v53, %v3129_v21  ;;  %v1597_v41 = vmul.f32 %v1536_v53, %v3138_v46  ;;  %v1598_v28 = vmul.f32 %v1536_v53, %v3142_v48  ;;  %v1827_v21 = vld [vmem:[%s2859_s16 + $0x58] sm:$0xff]  ;;  %v1828_v46 = vld [vmem:[%s2859_s16 + $0x60] sm:$0xff]  ;;  %v1829_v48 = vld [vmem:[%s2859_s16 + $0x68] sm:$0xff] }
 0x2c1   : > { %v1599_v52 = vmul.f32 %v1536_v53, %v3412_v26  ;;  %v1600_v60 = vmul.f32 %v1536_v53, %v3418_v35  ;;  %v1601_v33 = vmul.f32 %v1536_v53, %v3422_v45  ;;  %v1820_v53 = vld [vmem:[%s2859_s16 + $0x20] sm:$0xff] }
 0x2c3   : > { %v1680_v8 = vpop.permute.xlu0 %1679  ;;  %v1675_v55 = vpop.permute.xlu1 %1674 }
 0x2c4   : > { %v1739_v58 = vadd.f32 %v1680_v8, %v1595_v31  ;;  %v1740_v12 = vadd.f32 %v1680_v8, %v1596_v39  ;;  %v1741_v23 = vadd.f32 %v1680_v8, %v1597_v41  ;;  %v1742_v26 = vadd.f32 %v1680_v8, %v1598_v28  ;;  %v1821_v31 = vld [vmem:[%s2859_s16 + $0x28] sm:$0xff] }
 0x2c5   : > { %v1743_v35 = vadd.f32 %v1680_v8, %v1599_v52  ;;  %v1744_v45 = vadd.f32 %v1680_v8, %v1600_v60  ;;  %v1745_v9 = vadd.f32 %v1680_v8, %v1601_v33  ;;  %v1732_v5 = vadd.f32 %v1675_v55, %v1588_v32  ;;  %v1822_v32 = vld [vmem:[%s2859_s16 + $0x30] sm:$0xff] }
 0x2c6   : > { %v1907_v61 = vadd.f32 %v1823_v3, %v1739_v58  ;;  %v1908_v13 = vadd.f32 %v1824_v36, %v1740_v12  ;;  %v1909_v17 = vadd.f32 %v1825_v44, %v1741_v23  ;;  %v1910_v51 = vadd.f32 %v1826_v43, %v1742_v26  ;;  %v1838_v58 = vld [vmem:[%s2859_s16 + $0xb0] sm:$0xff] }
 0x2c7   : > { %v1911_v29 = vadd.f32 %v1827_v21, %v1743_v35  ;;  %v1912_v19 = vadd.f32 %v1828_v46, %v1744_v45  ;;  %v1913_v63 = vadd.f32 %v1829_v48, %v1745_v9  ;;  %v1733_v39 = vadd.f32 %v1675_v55, %v1589_v30  ;;  %v1541_v41 = vpop.permute.xlu1 %1540  ;;  %v1841_v35 = vld [vmem:[%s2859_s16 + $0xc8] sm:$0xff] }
 0x2c8   : > { %1991 = vst [vmem:[%s3735_s24 + $0x38] sm:$0xff] %v1907_v61  ;;  %1992 = vst [vmem:[%s3735_s24 + $0x40] sm:$0xff] %v1908_v13  ;;  %v1734_v28 = vadd.f32 %v1675_v55, %v1590_v27  ;;  %v1735_v30 = vadd.f32 %v1675_v55, %v1591_v49  ;;  %v1736_v3 = vadd.f32 %v1675_v55, %v1592_v7  ;;  %v1842_v61 = vld [vmem:[%s2859_s16 + $0xd0] sm:$0xff] }
 0x2c9   : > { %1993 = vst [vmem:[%s3735_s24 + $0x48] sm:$0xff] %v1909_v17  ;;  %1994 = vst [vmem:[%s3735_s24 + $0x50] sm:$0xff] %v1910_v51  ;;  %v1737_v52 = vadd.f32 %v1675_v55, %v1593_v15  ;;  %v1738_v60 = vadd.f32 %v1675_v55, %v1594_v40  ;;  %v1900_v33 = vadd.f32 %v1816_v25, %v1732_v5  ;;  %v1830_v25 = vld [vmem:[%s2859_s16 + $0x70] sm:$0xff] }
 0x2ca   : > { %1995 = vst [vmem:[%s3735_s24 + $0x58] sm:$0xff] %v1911_v29  ;;  %1996 = vst [vmem:[%s3735_s24 + $0x60] sm:$0xff] %v1912_v19  ;;  %v1901_v36 = vadd.f32 %v1817_v20, %v1733_v39  ;;  %v1902_v44 = vadd.f32 %v1818_v22, %v1734_v28  ;;  %v1903_v43 = vadd.f32 %v1819_v4, %v1735_v30  ;;  %v1832_v4 = vld [vmem:[%s2859_s16 + $0x80] sm:$0xff] }
 0x2cb   : > { %1997 = vst.msk [vmem:[%s3735_s24 + $0x68] sm:$0xff] %vm1100_vm1, %v1913_v63  ;;  %v1904_v8 = vadd.f32 %v1820_v53, %v1736_v3  ;;  %v1905_v21 = vadd.f32 %v1821_v31, %v1737_v52  ;;  %v1906_v27 = vadd.f32 %v1822_v32, %v1738_v60  ;;  %1984 = vst [vmem:[%s3735_s24] sm:$0xff] %v1900_v33  ;;  %v1546_v40 = vpop.permute.xlu1 %1545  ;;  %v1831_v63 = vld [vmem:[%s2859_s16 + $0x78] sm:$0xff]  ;;  %v1833_v53 = vld [vmem:[%s2859_s16 + $0x88] sm:$0xff] }
 0x2cc   : > { %1985 = vst [vmem:[%s3735_s24 + $0x8] sm:$0xff] %v1901_v36  ;;  %v1602_v49 = vmul.f32 %v1541_v41, %v3147_v54  ;;  %v1603_v7 = vmul.f32 %v1541_v41, %v3153_v57  ;;  %v1604_v15 = vmul.f32 %v1541_v41, %v3162_v0  ;;  %1986 = vst [vmem:[%s3735_s24 + $0x10] sm:$0xff] %v1902_v44  ;;  %v1690_v57 = vpop.permute.xlu0 %1689  ;;  %v1837_v0 = vld [vmem:[%s2859_s16 + $0xa8] sm:$0xff]  ;;  %v1835_v32 = vld [vmem:[%s2859_s16 + $0x98] sm:$0xff] }
 0x2cd   : > { %1987 = vst [vmem:[%s3735_s24 + $0x18] sm:$0xff] %v1903_v43  ;;  %1988 = vst [vmem:[%s3735_s24 + $0x20] sm:$0xff] %v1904_v8  ;;  %v1605_v55 = vmul.f32 %v1541_v41, %v3166_v2  ;;  %v1606_v46 = vmul.f32 %v1541_v41, %v3429_v38  ;;  %v1607_v48 = vmul.f32 %v1541_v41, %v3437_v14  ;;  %v1839_v14 = vld [vmem:[%s2859_s16 + $0xb8] sm:$0xff]  ;;  %v1836_v28 = vld [vmem:[%s2859_s16 + $0xa0] sm:$0xff] }
 0x2ce   : > { %1989 = vst [vmem:[%s3735_s24 + $0x28] sm:$0xff] %v1905_v21  ;;  %v1609_v54 = vmul.f32 %v1546_v40, %v3171_v6  ;;  %1990 = vst.msk [vmem:[%s3735_s24 + $0x30] sm:$0xff] %vm1100_vm1, %v1906_v27  ;;  %v1610_v12 = vmul.f32 %v1546_v40, %v3177_v11  ;;  %v1611_v23 = vmul.f32 %v1546_v40, %v3186_v16  ;;  %v1840_v6 = vld [vmem:[%s2859_s16 + $0xc0] sm:$0xff]  ;;  %v1843_v11 = vld [vmem:[%s2859_s16 + $0xd8] sm:$0xff] }
 0x2cf   : > { %v1612_v26 = vmul.f32 %v1546_v40, %v3190_v18  ;;  %v1613_v2 = vmul.f32 %v1546_v40, %v3449_v10  ;;  %v1608_v38 = vmul.f32 %v1541_v41, %v3442_v47  ;;  %v1614_v45 = vmul.f32 %v1546_v40, %v3456_v50  ;;  %v1685_v47 = vpop.permute.xlu1 %1684  ;;  %v1834_v41 = vld [vmem:[%s2859_s16 + $0x90] sm:$0xff] }
 0x2d0   : > { %v1615_v9 = vmul.f32 %v1546_v40, %v3461_v62  ;;  %v1753_v5 = vadd.f32 %v1690_v57, %v1609_v54  ;;  %v1754_v16 = vadd.f32 %v1690_v57, %v1610_v12  ;;  %v1755_v18 = vadd.f32 %v1690_v57, %v1611_v23  ;;  %v4192_v54 = vld [vmem:[#allocation12_spill] sm:$0xff]  ;;  %v1851_v23 = vld [vmem:[%s2859_s16 + $0x118] sm:$0xff] }
 0x2d1   : > { %v1756_v13 = vadd.f32 %v1690_v57, %v1612_v26  ;;  %v1757_v10 = vadd.f32 %v1690_v57, %v1613_v2  ;;  %v1758_v17 = vadd.f32 %v1690_v57, %v1614_v45  ;;  %v1746_v62 = vadd.f32 %v1685_v47, %v1602_v49  ;;  %v4194_v26 = vld [vmem:[#allocation14_spill] sm:$0xff]  ;;  %v4197_v45 = vld [vmem:[#allocation17_spill] sm:$0xff] }
 0x2d2   : > { %v1759_v51 = vadd.f32 %v1690_v57, %v1615_v9  ;;  %v1921_v50 = vadd.f32 %v1837_v0, %v1753_v5  ;;  %v1922_v20 = vadd.f32 %v1838_v58, %v1754_v16  ;;  %v1923_v22 = vadd.f32 %v1839_v14, %v1755_v18  ;;  %v4193_v0 = vld [vmem:[#allocation13_spill] sm:$0xff] }
 0x2d3   : > { %v1924_v29 = vadd.f32 %v1840_v6, %v1756_v13  ;;  %v1925_v19 = vadd.f32 %v1841_v35, %v1757_v10  ;;  %v1926_v31 = vadd.f32 %v1842_v61, %v1758_v17  ;;  %v1747_v30 = vadd.f32 %v1685_v47, %v1603_v7  ;;  %v1551_v44 = vpop.permute.xlu1 %1550  ;;  %v4196_v6 = vld [vmem:[#allocation16_spill] sm:$0xff]  ;;  %v1852_v61 = vld [vmem:[%s2859_s16 + $0x120] sm:$0xff]  ;;  %v1854_v16 = vld [vmem:[%s2859_s16 + $0x130] sm:$0xff] }
 0x2d4   : > { %v1927_v39 = vadd.f32 %v1843_v11, %v1759_v51  ;;  %2005 = vst [vmem:[%s3735_s24 + $0xa8] sm:$0xff] %v1921_v50  ;;  %v1748_v3 = vadd.f32 %v1685_v47, %v1604_v15  ;;  %2006 = vst [vmem:[%s3735_s24 + $0xb0] sm:$0xff] %v1922_v20  ;;  %v1749_v52 = vadd.f32 %v1685_v47, %v1605_v55  ;;  %v1700_v55 = vpop.permute.xlu0 %1699  ;;  %v1853_v11 = vld [vmem:[%s2859_s16 + $0x128] sm:$0xff]  ;;  %v4198_v13 = vld [vmem:[#allocation43_spill] sm:$0xff] }
 0x2d5   : > { %2007 = vst [vmem:[%s3735_s24 + $0xb8] sm:$0xff] %v1923_v22  ;;  %2008 = vst [vmem:[%s3735_s24 + $0xc0] sm:$0xff] %v1924_v29  ;;  %v1750_v60 = vadd.f32 %v1685_v47, %v1606_v46  ;;  %v1751_v33 = vadd.f32 %v1685_v47, %v1607_v48  ;;  %v1752_v36 = vadd.f32 %v1685_v47, %v1608_v38  ;;  %v4191_v46 = vld [vmem:[#allocation11_spill] sm:$0xff]  ;;  %v1855_v47 = vld [vmem:[%s2859_s16 + $0x138] sm:$0xff] }
 0x2d6   : > { %2009 = vst [vmem:[%s3735_s24 + $0xc8] sm:$0xff] %v1925_v19  ;;  %2010 = vst [vmem:[%s3735_s24 + $0xd0] sm:$0xff] %v1926_v31  ;;  %v1914_v43 = vadd.f32 %v1830_v25, %v1746_v62  ;;  %v1915_v8 = vadd.f32 %v1831_v63, %v1747_v30  ;;  %v1916_v21 = vadd.f32 %v1832_v4, %v1748_v3  ;;  %v4195_v38 = vld [vmem:[#allocation15_spill] sm:$0xff]  ;;  %v1857_v51 = vld [vmem:[%s2859_s16 + $0x148] sm:$0xff] }
 0x2d7   : > { %2011 = vst.msk [vmem:[%s3735_s24 + $0xd8] sm:$0xff] %vm1100_vm1, %v1927_v39  ;;  %v1917_v27 = vadd.f32 %v1833_v53, %v1749_v52  ;;  %v1918_v49 = vadd.f32 %v1834_v41, %v1750_v60  ;;  %v1919_v7 = vadd.f32 %v1835_v32, %v1751_v33  ;;  %v1920_v15 = vadd.f32 %v1836_v28, %v1752_v36  ;;  %v1856_v17 = vld [vmem:[%s2859_s16 + $0x140] sm:$0xff]  ;;  %v4199_v22 = vld [vmem:[#allocation42_spill] sm:$0xff]  ;;  %v1845_v32 = vld [vmem:[%s2859_s16 + $0xe8] sm:$0xff] }
 0x2d8   : > { %1998 = vst [vmem:[%s3735_s24 + $0x70] sm:$0xff] %v1914_v43  ;;  %1999 = vst [vmem:[%s3735_s24 + $0x78] sm:$0xff] %v1915_v8  ;;  %v1616_v40 = vmul.f32 %v1551_v44, %v3195_v24  ;;  %v1617_v48 = vmul.f32 %v1551_v44, %v4191_v46  ;;  %v1618_v57 = vmul.f32 %v1551_v44, %v4192_v54  ;;  %v1556_v24 = vpop.permute.xlu1 %1555  ;;  %v1844_v41 = vld [vmem:[%s2859_s16 + $0xe0] sm:$0xff]  ;;  %v1846_v52 = vld [vmem:[%s2859_s16 + $0xf0] sm:$0xff] }
 0x2d9   : > { %2000 = vst [vmem:[%s3735_s24 + $0x80] sm:$0xff] %v1916_v21  ;;  %2001 = vst [vmem:[%s3735_s24 + $0x88] sm:$0xff] %v1917_v27  ;;  %v1619_v58 = vmul.f32 %v1551_v44, %v4193_v0  ;;  %v1620_v12 = vmul.f32 %v1551_v44, %v3469_v56  ;;  %v1623_v2 = vmul.f32 %v1556_v24, %v4194_v26  ;;  %v1847_v60 = vld [vmem:[%s2859_s16 + $0xf8] sm:$0xff]  ;;  %v1848_v33 = vld [vmem:[%s2859_s16 + $0x100] sm:$0xff] }
 0x2da   : > { %2002 = vst [vmem:[%s3735_s24 + $0x90] sm:$0xff] %v1918_v49  ;;  %2003 = vst [vmem:[%s3735_s24 + $0x98] sm:$0xff] %v1919_v7  ;;  %v1624_v14 = vmul.f32 %v1556_v24, %v4195_v38  ;;  %v1625_v35 = vmul.f32 %v1556_v24, %v4196_v6  ;;  %v1626_v9 = vmul.f32 %v1556_v24, %v4197_v45  ;;  %v1850_v43 = vld [vmem:[%s2859_s16 + $0x110] sm:$0xff]  ;;  %v4201_v26 = vld [vmem:[#allocation31_spill] sm:$0xff] }
 0x2db   : > { %2004 = vst.msk [vmem:[%s3735_s24 + $0xa0] sm:$0xff] %vm1100_vm1, %v1920_v15  ;;  %v1621_v5 = vmul.f32 %v1551_v44, %v3475_v59  ;;  %v1627_v18 = vmul.f32 %v1556_v24, %v3487_v34  ;;  %v1628_v56 = vmul.f32 %v1556_v24, %v3494_v42  ;;  %v1629_v10 = vmul.f32 %v1556_v24, %v4198_v13  ;;  %v3819_v42 = vpop.permute.xlu0 %1709  ;;  %v4200_v24 = vld [vmem:[#allocation30_spill] sm:$0xff]  ;;  %v4202_v38 = vld [vmem:[#allocation32_spill] sm:$0xff]  ;;  %v4203_v6 = vld [vmem:[#allocation33_spill] sm:$0xff] }
 0x2dc   : > { %v1767_v50 = vadd.f32 %v1700_v55, %v1623_v2  ;;  %v1768_v25 = vadd.f32 %v1700_v55, %v1624_v14  ;;  %v1769_v62 = vadd.f32 %v1700_v55, %v1625_v35  ;;  %v1770_v20 = vadd.f32 %v1700_v55, %v1626_v9  ;;  %v1695_v63 = vpop.permute.xlu1 %1694  ;;  %v4207_v13 = vld [vmem:[#allocation20_spill] sm:$0xff] }
 0x2dd   : > { %v1622_v59 = vmul.f32 %v1551_v44, %v4199_v22  ;;  %v1771_v29 = vadd.f32 %v1700_v55, %v1627_v18  ;;  %v1772_v34 = vadd.f32 %v1700_v55, %v1628_v56  ;;  %v1773_v19 = vadd.f32 %v1700_v55, %v1629_v10  ;;  %v1849_v44 = vld [vmem:[%s2859_s16 + $0x108] sm:$0xff]  ;;  %v4206_v18 = vld [vmem:[#allocation19_spill] sm:$0xff]  ;;  %v4211_v22 = vld [vmem:[#allocation46_spill] sm:$0xff] }
 0x2de   : > { %v1935_v4 = vadd.f32 %v1851_v23, %v1767_v50  ;;  %v1936_v53 = vadd.f32 %v1852_v61, %v1768_v25  ;;  %v1937_v31 = vadd.f32 %v1853_v11, %v1769_v62  ;;  %v1938_v39 = vadd.f32 %v1854_v16, %v1770_v20  ;;  %v4205_v11 = vld [vmem:[#allocation18_spill] sm:$0xff]  ;;  %v4209_v50 = vld [vmem:[#allocation44_spill] sm:$0xff]  ;;  %v4210_v62 = vld [vmem:[#allocation45_spill] sm:$0xff] }
 0x2df   : > { %v1939_v28 = vadd.f32 %v1855_v47, %v1771_v29  ;;  %v1940_v30 = vadd.f32 %v1856_v17, %v1772_v34  ;;  %v1941_v3 = vadd.f32 %v1857_v51, %v1773_v19  ;;  %v1760_v36 = vadd.f32 %v1695_v63, %v1616_v40  ;;  %v1576_v55 = vpop.permute.xlu0 %1575  ;;  %v4208_v17 = vld [vmem:[#allocation21_spill] sm:$0xff]  ;;  %v1880_v29 = vld [vmem:[%s2859_s16 + $0x200] sm:$0xff]  ;;  %v1881_v34 = vld [vmem:[%s2859_s16 + $0x208] sm:$0xff] }
 0x2e0   : > { %2019 = vst [vmem:[%s3735_s24 + $0x118] sm:$0xff] %v1935_v4  ;;  %2020 = vst [vmem:[%s3735_s24 + $0x120] sm:$0xff] %v1936_v53  ;;  %v1761_v8 = vadd.f32 %v1695_v63, %v1617_v48  ;;  %v1762_v21 = vadd.f32 %v1695_v63, %v1618_v57  ;;  %v1763_v27 = vadd.f32 %v1695_v63, %v1619_v58  ;;  %v1561_v46 = vpop.permute.xlu1 %1560  ;;  %v1882_v19 = vld [vmem:[%s2859_s16 + $0x210] sm:$0xff]  ;;  %v1884_v4 = vld [vmem:[%s2859_s16 + $0x220] sm:$0xff] }
 0x2e1   : > { %2021 = vst [vmem:[%s3735_s24 + $0x128] sm:$0xff] %v1937_v31  ;;  %2022 = vst [vmem:[%s3735_s24 + $0x130] sm:$0xff] %v1938_v39  ;;  %v1764_v49 = vadd.f32 %v1695_v63, %v1620_v12  ;;  %v1765_v7 = vadd.f32 %v1695_v63, %v1621_v5  ;;  %v1766_v15 = vadd.f32 %v1695_v63, %v1622_v59  ;;  %v4204_v5 = vld [vmem:[#allocation53_spill] sm:$0xff]  ;;  %v1883_v63 = vld [vmem:[%s2859_s16 + $0x218] sm:$0xff] }
 0x2e2   : > { %2023 = vst [vmem:[%s3735_s24 + $0x138] sm:$0xff] %v1939_v28  ;;  %2024 = vst [vmem:[%s3735_s24 + $0x140] sm:$0xff] %v1940_v30  ;;  %v1928_v40 = vadd.f32 %v1844_v41, %v1760_v36  ;;  %v1929_v54 = vadd.f32 %v1845_v32, %v1761_v8  ;;  %v1930_v0 = vadd.f32 %v1846_v52, %v1762_v21  ;;  %v1885_v53 = vld [vmem:[%s2859_s16 + $0x228] sm:$0xff]  ;;  %v4212_v52 = vld [vmem:[#allocation22_spill] sm:$0xff] }
 0x2e3   : > { %2025 = vst.msk [vmem:[%s3735_s24 + $0x148] sm:$0xff] %vm1100_vm1, %v1941_v3  ;;  %v1931_v48 = vadd.f32 %v1847_v60, %v1763_v27  ;;  %v1932_v57 = vadd.f32 %v1848_v33, %v1764_v49  ;;  %v1933_v58 = vadd.f32 %v1849_v44, %v1765_v7  ;;  %v1934_v12 = vadd.f32 %v1850_v43, %v1766_v15  ;;  %v1720_v47 = vpop.permute.xlu0 %1719  ;;  %v4213_v7 = vld [vmem:[#allocation23_spill] sm:$0xff] }
 0x2e4   : > { %2012 = vst [vmem:[%s3735_s24 + $0xe0] sm:$0xff] %v1928_v40  ;;  %v1651_v23 = vmul.f32 %v1576_v55, %v4200_v24  ;;  %v1652_v2 = vmul.f32 %v1576_v55, %v4201_v26  ;;  %2013 = vst [vmem:[%s3735_s24 + $0xe8] sm:$0xff] %v1929_v54  ;;  %v1653_v14 = vmul.f32 %v1576_v55, %v4202_v38  ;;  %v1865_v40 = vld [vmem:[%s2859_s16 + $0x188] sm:$0xff]  ;;  %v1868_v26 = vld [vmem:[%s2859_s16 + $0x1a0] sm:$0xff] }
 0x2e5   : > { %2014 = vst [vmem:[%s3735_s24 + $0xf0] sm:$0xff] %v1930_v0  ;;  %2015 = vst [vmem:[%s3735_s24 + $0xf8] sm:$0xff] %v1931_v48  ;;  %v1654_v35 = vmul.f32 %v1576_v55, %v4203_v6  ;;  %v1655_v45 = vmul.f32 %v1576_v55, %v3563_v1  ;;  %v1656_v9 = vmul.f32 %v1576_v55, %v3570_v37  ;;  %v1879_v1 = vld [vmem:[%s2859_s16 + $0x1f8] sm:$0xff]  ;;  %v1566_v37 = vpop.permute.xlu1 %1565  ;;  %v4214_v54 = vld [vmem:[#allocation24_spill] sm:$0xff] }
 0x2e6   : > { %2016 = vst [vmem:[%s3735_s24 + $0x100] sm:$0xff] %v1932_v57  ;;  %2017 = vst [vmem:[%s3735_s24 + $0x108] sm:$0xff] %v1933_v58  ;;  %v1657_v61 = vmul.f32 %v1576_v55, %v4204_v5  ;;  %v1630_v16 = vmul.f32 %v1561_v46, %v4205_v11  ;;  %v3853_v56 = vmul.f32 %v1561_v46, %v4206_v18  ;;  %v1866_v55 = vld [vmem:[%s2859_s16 + $0x190] sm:$0xff]  ;;  %v4216_v58 = vld [vmem:[#allocation47_spill] sm:$0xff] }
 0x2e7   : > { %2018 = vst.msk [vmem:[%s3735_s24 + $0x110] sm:$0xff] %vm1100_vm1, %v1934_v12  ;;  %v3856_v10 = vmul.f32 %v1561_v46, %v4207_v13  ;;  %v3860_v51 = vmul.f32 %v1561_v46, %v4208_v17  ;;  %v3863_v25 = vmul.f32 %v1561_v46, %v4209_v50  ;;  %v3866_v20 = vmul.f32 %v1561_v46, %v4210_v62  ;;  %v4215_v48 = vld [vmem:[#allocation25_spill] sm:$0xff]  ;;  %v4217_v24 = vld [vmem:[#allocation48_spill] sm:$0xff]  ;;  %v1859_v62 = vld [vmem:[%s2859_s16 + $0x158] sm:$0xff] }
 0x2e8   : > { %v3869_v59 = vmul.f32 %v1561_v46, %v4211_v22  ;;  %v1795_v31 = vadd.f32 %v1720_v47, %v1651_v23  ;;  %v1796_v39 = vadd.f32 %v1720_v47, %v1652_v2  ;;  %v1797_v41 = vadd.f32 %v1720_v47, %v1653_v14  ;;  %v1867_v46 = vld [vmem:[%s2859_s16 + $0x198] sm:$0xff]  ;;  %v1869_v2 = vld [vmem:[%s2859_s16 + $0x1a8] sm:$0xff]  ;;  %v1870_v38 = vld [vmem:[%s2859_s16 + $0x1b0] sm:$0xff] }
 0x2e9   : > { %v1798_v32 = vadd.f32 %v1720_v47, %v1654_v35  ;;  %v1799_v28 = vadd.f32 %v1720_v47, %v1655_v45  ;;  %v1800_v30 = vadd.f32 %v1720_v47, %v1656_v9  ;;  %v1801_v3 = vadd.f32 %v1720_v47, %v1657_v61  ;;  %v1705_v8 = vpop.permute.xlu1 %1704  ;;  %v4218_v14 = vld [vmem:[#allocation49_spill] sm:$0xff]  ;;  %v1586_v9 = vpop.permute.xlu0 %1585  ;;  %v1871_v61 = vld [vmem:[%s2859_s16 + $0x1b8] sm:$0xff] }
 0x2ea   : > { %v1637_v60 = vmul.f32 %v1566_v37, %v4212_v52  ;;  %v1963_v33 = vadd.f32 %v1879_v1, %v1795_v31  ;;  %v1964_v36 = vadd.f32 %v1880_v29, %v1796_v39  ;;  %v1965_v44 = vadd.f32 %v1881_v34, %v1797_v41  ;;  %v1858_v50 = vld [vmem:[%s2859_s16 + $0x150] sm:$0xff]  ;;  %v1863_v39 = vld [vmem:[%s2859_s16 + $0x178] sm:$0xff]  ;;  %v1864_v41 = vld [vmem:[%s2859_s16 + $0x180] sm:$0xff] }
 0x2eb   : > { %v1966_v43 = vadd.f32 %v1882_v19, %v1798_v32  ;;  %v1967_v21 = vadd.f32 %v1883_v63, %v1799_v28  ;;  %v1968_v27 = vadd.f32 %v1884_v4, %v1800_v30  ;;  %v1969_v49 = vadd.f32 %v1885_v53, %v1801_v3  ;;  %v1860_v4 = vld [vmem:[%s2859_s16 + $0x160] sm:$0xff]  ;;  %v1861_v53 = vld [vmem:[%s2859_s16 + $0x168] sm:$0xff]  ;;  %v1862_v31 = vld [vmem:[%s2859_s16 + $0x170] sm:$0xff] }
 0x2ec   : > { %v1638_v15 = vmul.f32 %v1566_v37, %v4213_v7  ;;  %2047 = vst [vmem:[%s3735_s24 + $0x1f8] sm:$0xff] %v1963_v33  ;;  %2048 = vst [vmem:[%s3735_s24 + $0x200] sm:$0xff] %v1964_v36  ;;  %v1639_v0 = vmul.f32 %v1566_v37, %v4214_v54  ;;  %v1640_v57 = vmul.f32 %v1566_v37, %v4215_v48  ;;  %v4219_v36 = vld [vmem:[#allocation38_spill] sm:$0xff]  ;;  %v1893_v7 = vld [vmem:[%s2859_s16 + $0x268] sm:$0xff] }
 0x2ed   : > { %2049 = vst [vmem:[%s3735_s24 + $0x208] sm:$0xff] %v1965_v44  ;;  %2050 = vst [vmem:[%s3735_s24 + $0x210] sm:$0xff] %v1966_v43  ;;  %v1641_v12 = vmul.f32 %v1566_v37, %v4216_v58  ;;  %v1642_v23 = vmul.f32 %v1566_v37, %v4217_v24  ;;  %v1643_v6 = vmul.f32 %v1566_v37, %v4218_v14  ;;  %v3905_v47 = vpop.permute.xlu1 %1570  ;;  %v1730_v43 = vpop.permute.xlu0 %1729  ;;  %v4224_v54 = vld [vmem:[#allocation58_spill] sm:$0xff]  ;;  %v4225_v48 = vld [vmem:[#allocation59_spill] sm:$0xff] }
 0x2ee   : > { %2051 = vst [vmem:[%s3735_s24 + $0x218] sm:$0xff] %v1967_v21  ;;  %2052 = vst [vmem:[%s3735_s24 + $0x220] sm:$0xff] %v1968_v27  ;;  %v1781_v35 = vadd.f32 %v3819_v42, %v1637_v60  ;;  %v1782_v45 = vadd.f32 %v3819_v42, %v1638_v15  ;;  %v1774_v5 = vadd.f32 %v1705_v8, %v1630_v16  ;;  %v4221_v27 = vld [vmem:[#allocation40_spill] sm:$0xff]  ;;  %v4222_v15 = vld [vmem:[#allocation41_spill] sm:$0xff] }
 0x2ef   : > { %2053 = vst.msk [vmem:[%s3735_s24 + $0x228] sm:$0xff] %vm1100_vm1, %v1969_v49  ;;  %v1783_v11 = vadd.f32 %v3819_v42, %v1639_v0  ;;  %v1784_v18 = vadd.f32 %v3819_v42, %v1640_v57  ;;  %v1785_v13 = vadd.f32 %v3819_v42, %v1641_v12  ;;  %v1786_v1 = vadd.f32 %v3819_v42, %v1642_v23  ;;  %v1894_v58 = vld [vmem:[%s2859_s16 + $0x270] sm:$0xff]  ;;  %v1895_v12 = vld [vmem:[%s2859_s16 + $0x278] sm:$0xff]  ;;  %v1896_v24 = vld [vmem:[%s2859_s16 + $0x280] sm:$0xff] }
 0x2f0   : > { %v1787_v37 = vadd.f32 %v3819_v42, %v1643_v6  ;;  %v1949_v16 = vadd.f32 %v1865_v40, %v1781_v35  ;;  %v1950_v17 = vadd.f32 %v1866_v55, %v1782_v45  ;;  %v1775_v22 = vadd.f32 %v1705_v8, %v3853_v56  ;;  %v4223_v55 = vld [vmem:[#allocation57_spill] sm:$0xff]  ;;  %v1897_v23 = vld [vmem:[%s2859_s16 + $0x288] sm:$0xff]  ;;  %v4226_v35 = vld [vmem:[#allocation26_spill] sm:$0xff] }
 0x2f1   : > { %v1951_v29 = vadd.f32 %v1867_v46, %v1783_v11  ;;  %v1952_v34 = vadd.f32 %v1868_v26, %v1784_v18  ;;  %v1953_v19 = vadd.f32 %v1869_v2, %v1785_v13  ;;  %v1954_v63 = vadd.f32 %v1870_v38, %v1786_v1  ;;  %v1898_v26 = vld [vmem:[%s2859_s16 + $0x290] sm:$0xff]  ;;  %v1899_v2 = vld [vmem:[%s2859_s16 + $0x298] sm:$0xff] }
 0x2f2   : > { %v1955_v42 = vadd.f32 %v1871_v61, %v1787_v37  ;;  %2033 = vst [vmem:[%s3735_s24 + $0x188] sm:$0xff] %v1949_v16  ;;  %2034 = vst [vmem:[%s3735_s24 + $0x190] sm:$0xff] %v1950_v17  ;;  %v1776_v32 = vadd.f32 %v1705_v8, %v3856_v10  ;;  %v1777_v56 = vadd.f32 %v1705_v8, %v3860_v51  ;;  %v3927_v10 = vpop.permute.xlu1 %1714  ;;  %v4227_v16 = vld [vmem:[#allocation27_spill] sm:$0xff] }
 0x2f3   : > { %v1778_v28 = vadd.f32 %v1705_v8, %v3863_v25  ;;  %2035 = vst [vmem:[%s3735_s24 + $0x198] sm:$0xff] %v1951_v29  ;;  %2036 = vst [vmem:[%s3735_s24 + $0x1a0] sm:$0xff] %v1952_v34  ;;  %v1779_v30 = vadd.f32 %v1705_v8, %v3866_v20  ;;  %v1780_v3 = vadd.f32 %v1705_v8, %v3869_v59  ;;  %v4220_v8 = vld [vmem:[#allocation39_spill] sm:$0xff]  ;;  %v4228_v34 = vld [vmem:[#allocation28_spill] sm:$0xff] }
 0x2f4   : > { %2037 = vst [vmem:[%s3735_s24 + $0x1a8] sm:$0xff] %v1953_v19  ;;  %2038 = vst [vmem:[%s3735_s24 + $0x1b0] sm:$0xff] %v1954_v63  ;;  %v1942_v52 = vadd.f32 %v1858_v50, %v1774_v5  ;;  %v1943_v60 = vadd.f32 %v1859_v62, %v1775_v22  ;;  %v1944_v51 = vadd.f32 %v1860_v4, %v1776_v32  ;;  %v4229_v63 = vld [vmem:[#allocation29_spill] sm:$0xff]  ;;  %v1873_v32 = vld [vmem:[%s2859_s16 + $0x1c8] sm:$0xff] }
 0x2f5   : > { %2039 = vst.msk [vmem:[%s3735_s24 + $0x1b8] sm:$0xff] %vm1100_vm1, %v1955_v42  ;;  %v1945_v25 = vadd.f32 %v1861_v53, %v1777_v56  ;;  %v1946_v33 = vadd.f32 %v1862_v31, %v1778_v28  ;;  %v1665_v44 = vmul.f32 %v1586_v9, %v4219_v36  ;;  %v1947_v20 = vadd.f32 %v1863_v39, %v1779_v30  ;;  %v4230_v53 = vld [vmem:[#allocation50_spill] sm:$0xff]  ;;  %v4231_v42 = vld [vmem:[#allocation51_spill] sm:$0xff]  ;;  %v1874_v56 = vld [vmem:[%s2859_s16 + $0x1d0] sm:$0xff] }
 0x2f6   : > { %v1948_v59 = vadd.f32 %v1864_v41, %v1780_v3  ;;  %2026 = vst [vmem:[%s3735_s24 + $0x150] sm:$0xff] %v1942_v52  ;;  %2027 = vst [vmem:[%s3735_s24 + $0x158] sm:$0xff] %v1943_v60  ;;  %v1666_v21 = vmul.f32 %v1586_v9, %v4220_v8  ;;  %v1667_v49 = vmul.f32 %v1586_v9, %v4221_v27  ;;  %v1581_v18 = vpop.permute.xlu1 %1580  ;;  %v1872_v41 = vld [vmem:[%s2859_s16 + $0x1c0] sm:$0xff]  ;;  %v4232_v28 = vld [vmem:[#allocation52_spill] sm:$0xff] }
 0x2f7   : > { %2028 = vst [vmem:[%s3735_s24 + $0x160] sm:$0xff] %v1944_v51  ;;  %2029 = vst [vmem:[%s3735_s24 + $0x168] sm:$0xff] %v1945_v25  ;;  %v1668_v40 = vmul.f32 %v1586_v9, %v4222_v15  ;;  %v1669_v46 = vmul.f32 %v1586_v9, %v4223_v55  ;;  %v1670_v0 = vmul.f32 %v1586_v9, %v4224_v54  ;;  %v1875_v3 = vld [vmem:[%s2859_s16 + $0x1d8] sm:$0xff]  ;;  %v1876_v52 = vld [vmem:[%s2859_s16 + $0x1e0] sm:$0xff] }
 0x2f8   : > { %2030 = vst [vmem:[%s3735_s24 + $0x170] sm:$0xff] %v1946_v33  ;;  %v1671_v57 = vmul.f32 %v1586_v9, %v4225_v48  ;;  %2031 = vst [vmem:[%s3735_s24 + $0x178] sm:$0xff] %v1947_v20  ;;  %v1809_v38 = vadd.f32 %v1730_v43, %v1665_v44  ;;  %v1810_v14 = vadd.f32 %v1730_v43, %v1666_v21  ;;  %v1877_v60 = vld [vmem:[%s2859_s16 + $0x1e8] sm:$0xff]  ;;  %v4233_v33 = vld [vmem:[#allocation34_spill] sm:$0xff] }
 0x2f9   : > { %2032 = vst.msk [vmem:[%s3735_s24 + $0x180] sm:$0xff] %vm1100_vm1, %v1948_v59  ;;  %v1811_v6 = vadd.f32 %v1730_v43, %v1667_v49  ;;  %v1644_v45 = vmul.f32 %v3905_v47, %v4226_v35  ;;  %v1812_v5 = vadd.f32 %v1730_v43, %v1668_v40  ;;  %v1813_v9 = vadd.f32 %v1730_v43, %v1669_v46  ;;  %v1878_v44 = vld [vmem:[%s2859_s16 + $0x1f0] sm:$0xff]  ;;  %v4234_v49 = vld [vmem:[#allocation35_spill] sm:$0xff] }
 0x2fa   : > { %v1814_v61 = vadd.f32 %v1730_v43, %v1670_v0  ;;  %v1815_v11 = vadd.f32 %v1730_v43, %v1671_v57  ;;  %v1977_v13 = vadd.f32 %v1893_v7, %v1809_v38  ;;  %v1978_v1 = vadd.f32 %v1894_v58, %v1810_v14  ;;  %v1725_v15 = vpop.permute.xlu1 %1724  ;;  %v4236_v57 = vld [vmem:[#allocation37_spill] sm:$0xff]  ;;  %v4239_v14 = vld [vmem:[#allocation56_spill] sm:$0xff]  ;;  %v1888_v35 = vld [vmem:[%s2859_s16 + $0x240] sm:$0xff] }
 0x2fb   : > { %v1979_v37 = vadd.f32 %v1895_v12, %v1811_v6  ;;  %v1645_v17 = vmul.f32 %v3905_v47, %v4227_v16  ;;  %v1980_v50 = vadd.f32 %v1896_v24, %v1812_v5  ;;  %v1981_v62 = vadd.f32 %v1897_v23, %v1813_v9  ;;  %v4237_v12 = vld [vmem:[#allocation54_spill] sm:$0xff]  ;;  %v1886_v23 = vld [vmem:[%s2859_s16 + $0x230] sm:$0xff] }
 0x2fc   : > { %v1982_v22 = vadd.f32 %v1898_v26, %v1814_v61  ;;  %v1983_v29 = vadd.f32 %v1899_v2, %v1815_v11  ;;  %2061 = vst [vmem:[%s3735_s24 + $0x268] sm:$0xff] %v1977_v13  ;;  %2062 = vst [vmem:[%s3735_s24 + $0x270] sm:$0xff] %v1978_v1  ;;  %v1646_v19 = vmul.f32 %v3905_v47, %v4228_v34  ;;  %v1887_v26 = vld [vmem:[%s2859_s16 + $0x238] sm:$0xff]  ;;  %v4238_v2 = vld [vmem:[#allocation55_spill] sm:$0xff] }
 0x2fd   : > { %2063 = vst [vmem:[%s3735_s24 + $0x278] sm:$0xff] %v1979_v37  ;;  %v1647_v4 = vmul.f32 %v3905_v47, %v4229_v63  ;;  %v1648_v31 = vmul.f32 %v3905_v47, %v4230_v53  ;;  %v1649_v39 = vmul.f32 %v3905_v47, %v4231_v42  ;;  %2064 = vst [vmem:[%s3735_s24 + $0x280] sm:$0xff] %v1980_v50  ;;  %v1890_v5 = vld [vmem:[%s2859_s16 + $0x250] sm:$0xff]  ;;  %v1891_v11 = vld [vmem:[%s2859_s16 + $0x258] sm:$0xff] }
 0x2fe   : > { %2065 = vst [vmem:[%s3735_s24 + $0x288] sm:$0xff] %v1981_v62  ;;  %2066 = vst [vmem:[%s3735_s24 + $0x290] sm:$0xff] %v1982_v22  ;;  %v1650_v30 = vmul.f32 %v3905_v47, %v4232_v28  ;;  %v1788_v51 = vadd.f32 %v3927_v10, %v1644_v45  ;;  %v1789_v25 = vadd.f32 %v3927_v10, %v1645_v17  ;;  %v1889_v45 = vld [vmem:[%s2859_s16 + $0x248] sm:$0xff]  ;;  %v1892_v13 = vld [vmem:[%s2859_s16 + $0x260] sm:$0xff] }
 0x2ff   : > { %2067 = vst.msk [vmem:[%s3735_s24 + $0x298] sm:$0xff] %vm1100_vm1, %v1983_v29  ;;  %v1658_v36 = vmul.f32 %v1581_v18, %v4233_v33  ;;  %v1790_v43 = vadd.f32 %v3927_v10, %v1646_v19  ;;  %v1791_v20 = vadd.f32 %v3927_v10, %v1647_v4  ;;  %v1792_v59 = vadd.f32 %v3927_v10, %v1648_v31 }
 0x300   : > { %v1793_v47 = vadd.f32 %v3927_v10, %v1649_v39  ;;  %v1794_v8 = vadd.f32 %v3927_v10, %v1650_v30  ;;  %v1956_v21 = vadd.f32 %v1872_v41, %v1788_v51  ;;  %v1957_v27 = vadd.f32 %v1873_v32, %v1789_v25  ;;  %v4235_v10 = vld [vmem:[#allocation36_spill] sm:$0xff] }
 0x301   : > { %v1659_v7 = vmul.f32 %v1581_v18, %v4234_v49  ;;  %v1958_v40 = vadd.f32 %v1874_v56, %v1790_v43  ;;  %v1959_v55 = vadd.f32 %v1875_v3, %v1791_v20  ;;  %v1960_v46 = vadd.f32 %v1876_v52, %v1792_v59 }
 0x302   : > { %v1961_v54 = vadd.f32 %v1877_v60, %v1793_v47  ;;  %v1962_v0 = vadd.f32 %v1878_v44, %v1794_v8  ;;  %2040 = vst [vmem:[%s3735_s24 + $0x1c0] sm:$0xff] %v1956_v21  ;;  %2041 = vst [vmem:[%s3735_s24 + $0x1c8] sm:$0xff] %v1957_v27  ;;  %v1660_v48 = vmul.f32 %v1581_v18, %v4235_v10 }
 0x303   : > { %v1661_v58 = vmul.f32 %v1581_v18, %v4236_v57  ;;  %v1662_v24 = vmul.f32 %v1581_v18, %v4237_v12  ;;  %2042 = vst [vmem:[%s3735_s24 + $0x1d0] sm:$0xff] %v1958_v40  ;;  %2043 = vst [vmem:[%s3735_s24 + $0x1d8] sm:$0xff] %v1959_v55  ;;  %v1663_v38 = vmul.f32 %v1581_v18, %v4238_v2 }
 0x304   : > { %2044 = vst [vmem:[%s3735_s24 + $0x1e0] sm:$0xff] %v1960_v46  ;;  %2045 = vst [vmem:[%s3735_s24 + $0x1e8] sm:$0xff] %v1961_v54  ;;  %v1664_v6 = vmul.f32 %v1581_v18, %v4239_v14  ;;  %v1802_v9 = vadd.f32 %v1725_v15, %v1658_v36  ;;  %v1803_v61 = vadd.f32 %v1725_v15, %v1659_v7 }
 0x305   : > { %2046 = vst.msk [vmem:[%s3735_s24 + $0x1f0] sm:$0xff] %vm1100_vm1, %v1962_v0  ;;  %v1804_v1 = vadd.f32 %v1725_v15, %v1660_v48  ;;  %v1805_v37 = vadd.f32 %v1725_v15, %v1661_v58  ;;  %v1806_v16 = vadd.f32 %v1725_v15, %v1662_v24  ;;  %v1807_v17 = vadd.f32 %v1725_v15, %v1663_v38 }
 0x306   : > { %v1808_v18 = vadd.f32 %v1725_v15, %v1664_v6  ;;  %v1970_v50 = vadd.f32 %v1886_v23, %v1802_v9  ;;  %v1971_v62 = vadd.f32 %v1887_v26, %v1803_v61 }
 0x307   : > { %v1972_v22 = vadd.f32 %v1888_v35, %v1804_v1  ;;  %v1973_v29 = vadd.f32 %v1889_v45, %v1805_v37  ;;  %v1974_v34 = vadd.f32 %v1890_v5, %v1806_v16  ;;  %v1975_v19 = vadd.f32 %v1891_v11, %v1807_v17 }
 0x308   : > { %v1976_v63 = vadd.f32 %v1892_v13, %v1808_v18  ;;  %2054 = vst [vmem:[%s3735_s24 + $0x230] sm:$0xff] %v1970_v50  ;;  %2055 = vst [vmem:[%s3735_s24 + $0x238] sm:$0xff] %v1971_v62 }
 0x309   : > { %2056 = vst [vmem:[%s3735_s24 + $0x240] sm:$0xff] %v1972_v22  ;;  %2057 = vst [vmem:[%s3735_s24 + $0x248] sm:$0xff] %v1973_v29 }
 0x30a   : > { %2058 = vst [vmem:[%s3735_s24 + $0x250] sm:$0xff] %v1974_v34  ;;  %2059 = vst [vmem:[%s3735_s24 + $0x258] sm:$0xff] %v1975_v19 }
 0x30b   : > { %2060 = vst.msk [vmem:[%s3735_s24 + $0x260] sm:$0xff] %vm1100_vm1, %v1976_v63 }
 0x30c   : > { %2613 = shalt.err (!%p2610_p9)
}
 0x30d   : > { %s2614_s9 = scalar_lea.hbm %s4016_s12, 10752  ;;  %s2618_s23 = scalar_lea.hbm %s4075_s5, 21504 }
 0x30e   : > { %p2615_p1 = scmp.ne.s32.totalorder %s4016_s12, %s2614_s9  ;;  %p2619_p2 = scmp.lt.u32.totalorder %s4016_s12, %s4075_s5 }
 0x30f   : > { %p2620_p13 = scmp.lt.u32.totalorder %s2618_s23, %s2614_s9  ;;  %p2622_p6 = scmp.lt.u32.totalorder %s2614_s9, %s4016_s12 }
 0x310   : > { %p2616_p0 = pnand %p2615_p1, %p2797_p10 }
 0x311   : > { %p2621_p4 = por %p2620_p13, %p2619_p2 }
 0x312   : > { %p2617_p5 = pneg %p2616_p0 }
 0x313   : > { %p2623_p8 = por %p2622_p6, %p2621_p4 }
 0x315   : > { %p2624_p12 = pnand %p2623_p8, %p2617_p5 }
 0x317   : > { %2627 = shalt.err (!%p2624_p12)
}
 0x318   : > { %s2679_s11 = smov 896   ;;  %s2680_s16 = smov 56  }
 0x319   : > { %2457 = dma.vmem_to_hbm [thread:$0]  (%p2797_p10), %s4020_s22, 10752, %s4016_s12, %s2069_s14, %s2679_s11, %s2679_s11, %s2680_s16  }
 0x31a PF: > { %s2098_s26 = sand.u32 1, %s2658_s18   ;;  %p4240_p11 = scmp.ne.s32.totalorder %s4130_s25, 0 }
 0x31b   : > { %p4241_p3 = scmp.ge.s32.totalorder %s2670_s21, 2  ;;  %s2099_s17 = scalar_lea.sflag [#allocation4], %s2098_s26 }
 0x31d   : > { %p2468_p7 = pnand %p4241_p3, %p4240_p11 }
 0x31f   : > { %2653 = dma.done.wait (!%p2468_p7), %s2099_s17, 10752  }
 0x320   : > { %2655 = vsyncadd (!%p2468_p7), %s2099_s17, 4294956544  ;;  %p19_p9 = scmp.ge.s32.totalorder %s2765_s30, 4   ;;  %s4242_s18 = smov %s2662_s19 }
 0x321   : > { %s4243_s19 = smov %s2666_s20  ;;  %s4244_s20 = smov %s2793_s7 }
 0x322   : > { %s4245_s21 = smov %s2765_s30  ;;  %21 = sbr.rel (!%p19_p9) target bundleno = 6 (0x6), region = 99 }
 0x329   :  { %2104 = vsyncpa [#allocation3], 1 }
 0x32a   :  { %2106 = vsyncpa [#allocation3 + $0x1], 1 }
 0x32b   :  { %2107 = vsyncpa [#allocation6], 1 }
 0x32c   :  { %2109 = vsyncpa [#allocation6 + $0x1], 1 }
 0x32d   :  { %2110 = vsyncpa [#allocation4], 1 }
 0x32e   :  { %2112 = vsyncpa [#allocation4 + $0x1], 1 }

</bundles_post_ra>
